<compile_context>
chip_gen: v7x
topology: tpu7x:2x2x1
jax: 0.10.0
libtpu: 0.0.40
codegen_flags: <defaults>
</compile_context>

<pallas_src>
import math
import jax
import jax.numpy as jnp
from jax.experimental import pallas as pl
from jax.experimental.pallas import tpu as pltpu

# ----------------------------- config (small synthetic RoBERTa) -----------------
BS = 2          # batch size
S = 8           # sequence length
D = 32          # hidden size (d_model)
H = 2           # attention heads
HEAD_DIM = D // H
F = 64          # FFN intermediate size
L = 2           # number of encoder layers
VOCAB = 64
PAD_ID = 1      # RoBERTa <pad>
BOS_ID = 0      # <s>
EOS_ID = 2      # </s>
MAX_POS = 16
LN_EPS = 1e-5
M = BS * S      # rows fed to the MXU


# ----------------------------- in-kernel helpers --------------------------------
def _ln(x, gamma, beta):
    mu = jnp.mean(x, axis=-1, keepdims=True)
    var = jnp.mean((x - mu) ** 2, axis=-1, keepdims=True)
    return (x - mu) * jax.lax.rsqrt(var + LN_EPS) * gamma + beta


def _gelu(x):
    # TODO(synk): HF RoBERTa uses exact erf-based GELU; tanh approximation used here
    # to stay within guaranteed Mosaic transcendental support (exp/tanh).
    c = math.sqrt(2.0 / math.pi)
    return 0.5 * x * (1.0 + jnp.tanh(c * (x + 0.044715 * x * x * x)))


# ----------------------------- fused encoder kernel ------------------------------
def encoder_kernel(x_ref, mask_ref, embln_ref,
                   wqkv_ref, bqkv_ref, wo_ref, w1_ref, b1_ref, w2_ref, vecd_ref,
                   o_ref):
    embln = embln_ref[...]                        # (2, D): [gamma, beta]
    h = _ln(x_ref[...], embln[0:1], embln[1:2])   # (M, D) embedding LayerNorm

    # Hoisted out of the layer loop: JAX does not CSE broadcast_in_dim.
    mask_b = jnp.broadcast_to(mask_ref[...], (BS, S, S))   # additive 0 / -1e9, f32

    for l in range(L):                            # unrolled at trace time (L small)
        wqkv = wqkv_ref[l]                        # (D, 3D) bf16, Q cols pre-scaled
        bqkv = bqkv_ref[l]                        # (1, 3D) f32, Q cols pre-scaled
        wo = wo_ref[l]                            # (D, D)  bf16
        w1 = w1_ref[l]                            # (D, F)  bf16
        b1 = b1_ref[l]                            # (1, F)  f32
        w2 = w2_ref[l]                            # (F, D)  bf16
        vecd = vecd_ref[l]                        # (6, D): bo, b2, ln1_g/b, ln2_g/b
        bo, b2 = vecd[0:1], vecd[1:2]
        ln1_g, ln1_b = vecd[2:3], vecd[3:4]
        ln2_g, ln2_b = vecd[4:5], vecd[5:6]

        # --- multi-head self-attention --------------------------------------
        # fused QKV projection: one (M, D) x (D, 3D) matmul, whole batch at once
        qkv = jnp.dot(h.astype(jnp.bfloat16), wqkv,
                      preferred_element_type=jnp.float32) + bqkv        # (M, 3D)
        qkv_bf = qkv.astype(jnp.bfloat16)         # single f32->bf16 cast

        ctx_heads = []
        for hd in range(H):                       # heads sliced off the lane axis
            lo = hd * HEAD_DIM
            q_h = qkv_bf[:, lo:lo + HEAD_DIM].reshape(BS, S, HEAD_DIM)
            k_h = qkv_bf[:, D + lo:D + lo + HEAD_DIM].reshape(BS, S, HEAD_DIM)
            v_h = qkv_bf[:, 2 * D + lo:2 * D + lo + HEAD_DIM].reshape(BS, S, HEAD_DIM)

            s = jnp.einsum('bqd,bkd->bqk', q_h, k_h,
                           preferred_element_type=jnp.float32)          # (BS, S, S)
            s = s + mask_b                                              # f32 mask add
            s = s - jnp.max(s, axis=-1, keepdims=True)
            p = jnp.exp(s)
            p = p * pl.reciprocal(jnp.sum(p, axis=-1, keepdims=True), approx=True)

            ctx = jnp.einsum('bqk,bkd->bqd', p.astype(jnp.bfloat16), v_h,
                             preferred_element_type=jnp.float32)        # (BS, S, Hd)
            ctx_heads.append(ctx.reshape(M, HEAD_DIM))

        # fused output projection + head reduction: one (M, D) x (D, D) matmul
        ctx_all = jnp.concatenate(ctx_heads, axis=-1).astype(jnp.bfloat16)  # (M, D)
        attn = jnp.dot(ctx_all, wo, preferred_element_type=jnp.float32) + bo
        h1 = _ln(h + attn, ln1_g, ln1_b)

        # --- feed-forward ----------------------------------------------------
        ff = jnp.dot(h1.astype(jnp.bfloat16), w1,
                     preferred_element_type=jnp.float32) + b1
        ff = _gelu(ff)
        ff = jnp.dot(ff.astype(jnp.bfloat16), w2,
                     preferred_element_type=jnp.float32) + b2
        h = _ln(h1 + ff, ln2_g, ln2_b)

    o_ref[...] = h


def encoder_pallas(emb_flat, add_mask, pk):
    def full(shape):
        n = len(shape)
        return pl.BlockSpec(shape, lambda i, _n=n: (0,) * _n)

    return pl.pallas_call(
        encoder_kernel,
        out_shape=jax.ShapeDtypeStruct((M, D), jnp.float32),
        grid=(1,),                                       # whole batch in one step
        in_specs=[
            full((M, D)),                                # summed embeddings (flat)
            full((BS, 1, S)),                            # additive mask (0 / -1e9)
            full((2, D)),                                # emb LN gamma/beta
            full((L, D, 3 * D)),                         # fused Wqkv (bf16)
            full((L, 1, 3 * D)),                         # fused bqkv
            full((L, D, D)),                             # wo (bf16)
            full((L, D, F)),                             # w1 (bf16)
            full((L, 1, F)),                             # b1
            full((L, F, D)),                             # w2 (bf16)
            full((L, 6, D)),                             # bo,b2,ln1,ln2
        ],
        out_specs=full((M, D)),
        compiler_params=pltpu.CompilerParams(dimension_semantics=("arbitrary",)),
    )(emb_flat, add_mask, pk["emb_ln"], pk["wqkv"], pk["bqkv"], pk["wo"],
      pk["w1"], pk["b1"], pk["w2"], pk["vecd"])


# ----------------------------- parameter init & packing --------------------------
def init_params(key):
    ks = iter(jax.random.split(key, 3 + 6 * L))

    def w(shape):
        return 0.02 * jax.random.normal(next(ks), shape, jnp.float32)

    params = {
        # padding_idx rows are zero, matching HF RobertaEmbeddings.
        "word_emb": w((VOCAB, D)).at[PAD_ID].set(0.0),
        "pos_emb": w((MAX_POS, D)).at[PAD_ID].set(0.0),
        "type_emb": w((1, D)),
        "emb_ln_g": jnp.ones((1, D), jnp.float32),
        "emb_ln_b": jnp.zeros((1, D), jnp.float32),
        "layers": [],
    }
    for _ in range(L):
        params["layers"].append({
            "wq": w((D, D)), "bq": jnp.zeros((1, D), jnp.float32),
            "wk": w((D, D)), "bk": jnp.zeros((1, D), jnp.float32),
            "wv": w((D, D)), "bv": jnp.zeros((1, D), jnp.float32),
            "wo": w((D, D)), "bo": jnp.zeros((1, D), jnp.float32),
            "ln1_g": jnp.ones((1, D), jnp.float32), "ln1_b": jnp.zeros((1, D), jnp.float32),
            "w1": w((D, F)), "b1": jnp.zeros((1, F), jnp.float32),
            "w2": w((F, D)), "b2": jnp.zeros((1, D), jnp.float32),
            "ln2_g": jnp.ones((1, D), jnp.float32), "ln2_b": jnp.zeros((1, D), jnp.float32),
        })
    return params


def pack_params(p):
    """Pack per-layer weights into a few stacked slabs; bf16 for MXU operands.

    Q/K/V weights are fused column-wise into one (D, 3D) slab (head h of Q lives
    in columns [h*Hd, (h+1)*Hd), etc.), and the attention scale 1/sqrt(Hd) is
    folded into the Q columns (and Q bias) once on the host.
    """
    scale = 1.0 / math.sqrt(HEAD_DIM)
    wqkv, bqkv, wo, w1, b1, w2, vecd = [], [], [], [], [], [], []
    for lp in p["layers"]:
        wqkv.append(jnp.concatenate([lp["wq"] * scale, lp["wk"], lp["wv"]], axis=1))
        bqkv.append(jnp.concatenate([lp["bq"] * scale, lp["bk"], lp["bv"]], axis=1))
        wo.append(lp["wo"])
        w1.append(lp["w1"])
        b1.append(lp["b1"])
        w2.append(lp["w2"])
        vecd.append(jnp.concatenate(
            [lp["bo"], lp["b2"], lp["ln1_g"], lp["ln1_b"], lp["ln2_g"], lp["ln2_b"]], axis=0))

    return {
        "word_emb": p["word_emb"],
        "pos_emb": p["pos_emb"],
        "type_emb": p["type_emb"],
        "emb_ln": jnp.concatenate([p["emb_ln_g"], p["emb_ln_b"]], axis=0),   # (2, D)
        "wqkv": jnp.stack(wqkv).astype(jnp.bfloat16),   # (L, D, 3D)
        "bqkv": jnp.stack(bqkv),                        # (L, 1, 3D)
        "wo": jnp.stack(wo).astype(jnp.bfloat16),       # (L, D, D)
        "w1": jnp.stack(w1).astype(jnp.bfloat16),       # (L, D, F)
        "b1": jnp.stack(b1),                            # (L, 1, F)
        "w2": jnp.stack(w2).astype(jnp.bfloat16),       # (L, F, D)
        "vecd": jnp.stack(vecd),                        # (L, 6, D)
    }


# ----------------------------- forward (== RobertaEncoder.forward) ---------------
def roberta_encoder_forward(token_ids, attn_masks, packed):
    """Returns (cont_reps [BS, S, D], token_ids [BS, S]) like the PyTorch module."""
    # TODO(synk): robertify_input() tokenization is string processing with no TPU
    # kernel equivalent; token_ids / attn_masks are consumed directly.
    # RoBERTa position ids: cumsum over the attention mask, offset by pad id.
    pos_ids = jnp.cumsum(attn_masks, axis=1) * attn_masks + PAD_ID
    emb = (jnp.take(packed["word_emb"], token_ids, axis=0)
           + jnp.take(packed["pos_emb"], pos_ids, axis=0)
           + packed["type_emb"][0])
    # additive attention mask: 0 for real tokens, -1e9 for padding (kept in f32).
    add_mask = ((1.0 - attn_masks.astype(jnp.float32)) * -1e9).reshape(BS, 1, S)
    flat = encoder_pallas(emb.reshape(M, D).astype(jnp.float32), add_mask, packed)
    return flat.reshape(BS, S, D), token_ids


# ----------------------------- main ----------------------------------------------
if __name__ == "__main__":
    key = jax.random.PRNGKey(0)
    k_ids, k_params = jax.random.split(key)

    # Simulated output of `robertify_input`: <s> tokens </s> <pad>...
    lengths = jnp.array([S, S - 3], dtype=jnp.int32)          # ragged batch
    ids = jax.random.randint(k_ids, (BS, S), 3, VOCAB, dtype=jnp.int32)
    pos_idx = jnp.arange(S, dtype=jnp.int32)[None, :]
    ids = jnp.where(pos_idx < lengths[:, None], ids, PAD_ID)
    ids = ids.at[:, 0].set(BOS_ID)
    ids = ids.at[jnp.arange(BS), lengths - 1].set(EOS_ID)
    attn_masks = (ids != PAD_ID).astype(jnp.int32)

    packed = pack_params(init_params(k_params))

    fwd = jax.jit(roberta_encoder_forward)
    cont_reps, token_ids = fwd(ids, attn_masks, packed)
    cont_reps = jax.block_until_ready(cont_reps)
    token_ids = jax.block_until_ready(token_ids)

    assert cont_reps.shape == (BS, S, D) and cont_reps.dtype == jnp.float32
    assert token_ids.shape == (BS, S)
    assert bool(jnp.all(jnp.isfinite(cont_reps)))
    print("KERNEL_OK")
</pallas_src>

<mosaic_0001>
module attributes {stable_mosaic.version = 11 : i64} {
  func.func @encoder_kernel(%arg0: i32, %arg1: memref<16x32xf32, #tpu.memory_space<vmem>>, %arg2: memref<2x1x8xf32, #tpu.memory_space<vmem>>, %arg3: memref<2x32xf32, #tpu.memory_space<vmem>>, %arg4: memref<2x32x96xbf16, #tpu.memory_space<vmem>>, %arg5: memref<2x1x96xf32, #tpu.memory_space<vmem>>, %arg6: memref<2x32x32xbf16, #tpu.memory_space<vmem>>, %arg7: memref<2x32x64xbf16, #tpu.memory_space<vmem>>, %arg8: memref<2x1x64xf32, #tpu.memory_space<vmem>>, %arg9: memref<2x64x32xbf16, #tpu.memory_space<vmem>>, %arg10: memref<2x6x32xf32, #tpu.memory_space<vmem>>, %arg11: memref<16x32xf32, #tpu.memory_space<vmem>>) attributes {dimension_semantics = [#tpu.dimension_semantics<arbitrary>], iteration_bounds = array<i64: 1>, scalar_prefetch = 0 : i64, scratch_operands = 0 : i64, tpu.core_type = #tpu.core_type<tc>, window_params = [{pipeline_mode = #tpu.pipeline_mode<synchronous>, transform_indices = @transform_0, window_bounds = array<i64: 16, 32>}, {pipeline_mode = #tpu.pipeline_mode<synchronous>, transform_indices = @transform_1, window_bounds = array<i64: 2, 1, 8>}, {pipeline_mode = #tpu.pipeline_mode<synchronous>, transform_indices = @transform_2, window_bounds = array<i64: 2, 32>}, {pipeline_mode = #tpu.pipeline_mode<synchronous>, transform_indices = @transform_3, window_bounds = array<i64: 2, 32, 96>}, {pipeline_mode = #tpu.pipeline_mode<synchronous>, transform_indices = @transform_4, window_bounds = array<i64: 2, 1, 96>}, {pipeline_mode = #tpu.pipeline_mode<synchronous>, transform_indices = @transform_5, window_bounds = array<i64: 2, 32, 32>}, {pipeline_mode = #tpu.pipeline_mode<synchronous>, transform_indices = @transform_6, window_bounds = array<i64: 2, 32, 64>}, {pipeline_mode = #tpu.pipeline_mode<synchronous>, transform_indices = @transform_7, window_bounds = array<i64: 2, 1, 64>}, {pipeline_mode = #tpu.pipeline_mode<synchronous>, transform_indices = @transform_8, window_bounds = array<i64: 2, 64, 32>}, {pipeline_mode = #tpu.pipeline_mode<synchronous>, transform_indices = @transform_9, window_bounds = array<i64: 2, 6, 32>}, {pipeline_mode = #tpu.pipeline_mode<synchronous>, transform_indices = @transform_10, window_bounds = array<i64: 16, 32>}]} {
    %c0 = arith.constant 0 : index
    %c0_0 = arith.constant 0 : index
    %0 = vector.load %arg3[%c0, %c0_0] : memref<2x32xf32, #tpu.memory_space<vmem>>, vector<2x32xf32>
    %c0_1 = arith.constant 0 : index
    %c0_2 = arith.constant 0 : index
    %1 = vector.load %arg1[%c0_1, %c0_2] : memref<16x32xf32, #tpu.memory_space<vmem>>, vector<16x32xf32>
    %2 = vector.extract_strided_slice %0 {offsets = [0, 0], sizes = [1, 32], strides = [1, 1]} : vector<2x32xf32> to vector<1x32xf32>
    %3 = vector.extract_strided_slice %0 {offsets = [1, 0], sizes = [1, 32], strides = [1, 1]} : vector<2x32xf32> to vector<1x32xf32>
    %cst = arith.constant dense<0.000000e+00> : vector<16xf32>
    %4 = vector.multi_reduction <add>, %1, %cst [1] : vector<16x32xf32> to vector<16xf32>
    %5 = vector.shape_cast %4 : vector<16xf32> to vector<16x1xf32>
    %cst_3 = arith.constant 3.200000e+01 : f32
    %6 = vector.broadcast %cst_3 : f32 to vector<16x1xf32>
    %7 = arith.divf %5, %6 : vector<16x1xf32>
    %8 = vector.broadcast %7 : vector<16x1xf32> to vector<16x32xf32>
    %9 = arith.subf %1, %8 : vector<16x32xf32>
    %10 = arith.mulf %9, %9 : vector<16x32xf32>
    %cst_4 = arith.constant dense<0.000000e+00> : vector<16xf32>
    %11 = vector.multi_reduction <add>, %10, %cst_4 [1] : vector<16x32xf32> to vector<16xf32>
    %12 = vector.shape_cast %11 : vector<16xf32> to vector<16x1xf32>
    %cst_5 = arith.constant 3.200000e+01 : f32
    %13 = vector.broadcast %cst_5 : f32 to vector<16x1xf32>
    %14 = arith.divf %12, %13 : vector<16x1xf32>
    %15 = vector.broadcast %7 : vector<16x1xf32> to vector<16x32xf32>
    %16 = arith.subf %1, %15 : vector<16x32xf32>
    %cst_6 = arith.constant 9.99999974E-6 : f32
    %17 = vector.broadcast %cst_6 : f32 to vector<16x1xf32>
    %18 = arith.addf %14, %17 : vector<16x1xf32>
    %19 = math.rsqrt %18 : vector<16x1xf32>
    %20 = vector.broadcast %19 : vector<16x1xf32> to vector<16x32xf32>
    %21 = arith.mulf %16, %20 : vector<16x32xf32>
    %22 = vector.broadcast %2 : vector<1x32xf32> to vector<16x32xf32>
    %23 = arith.mulf %21, %22 : vector<16x32xf32>
    %24 = vector.broadcast %3 : vector<1x32xf32> to vector<16x32xf32>
    %25 = arith.addf %23, %24 : vector<16x32xf32>
    %c0_7 = arith.constant 0 : index
    %c0_8 = arith.constant 0 : index
    %c0_9 = arith.constant 0 : index
    %26 = vector.load %arg2[%c0_7, %c0_8, %c0_9] : memref<2x1x8xf32, #tpu.memory_space<vmem>>, vector<2x1x8xf32>
    %27 = vector.shape_cast %26 : vector<2x1x8xf32> to vector<2x1x8xf32>
    %28 = vector.broadcast %27 : vector<2x1x8xf32> to vector<2x8x8xf32>
    %c0_10 = arith.constant 0 : index
    %c0_11 = arith.constant 0 : index
    %c0_12 = arith.constant 0 : index
    %29 = vector.load %arg4[%c0_10, %c0_11, %c0_12] : memref<2x32x96xbf16, #tpu.memory_space<vmem>>, vector<1x32x96xbf16>
    %30 = vector.shape_cast %29 : vector<1x32x96xbf16> to vector<32x96xbf16>
    %c0_13 = arith.constant 0 : index
    %c0_14 = arith.constant 0 : index
    %c0_15 = arith.constant 0 : index
    %31 = vector.load %arg5[%c0_13, %c0_14, %c0_15] : memref<2x1x96xf32, #tpu.memory_space<vmem>>, vector<1x1x96xf32>
    %32 = vector.shape_cast %31 : vector<1x1x96xf32> to vector<1x96xf32>
    %c0_16 = arith.constant 0 : index
    %c0_17 = arith.constant 0 : index
    %c0_18 = arith.constant 0 : index
    %33 = vector.load %arg6[%c0_16, %c0_17, %c0_18] : memref<2x32x32xbf16, #tpu.memory_space<vmem>>, vector<1x32x32xbf16>
    %34 = vector.shape_cast %33 : vector<1x32x32xbf16> to vector<32x32xbf16>
    %c0_19 = arith.constant 0 : index
    %c0_20 = arith.constant 0 : index
    %c0_21 = arith.constant 0 : index
    %35 = vector.load %arg7[%c0_19, %c0_20, %c0_21] : memref<2x32x64xbf16, #tpu.memory_space<vmem>>, vector<1x32x64xbf16>
    %36 = vector.shape_cast %35 : vector<1x32x64xbf16> to vector<32x64xbf16>
    %c0_22 = arith.constant 0 : index
    %c0_23 = arith.constant 0 : index
    %c0_24 = arith.constant 0 : index
    %37 = vector.load %arg8[%c0_22, %c0_23, %c0_24] : memref<2x1x64xf32, #tpu.memory_space<vmem>>, vector<1x1x64xf32>
    %38 = vector.shape_cast %37 : vector<1x1x64xf32> to vector<1x64xf32>
    %c0_25 = arith.constant 0 : index
    %c0_26 = arith.constant 0 : index
    %c0_27 = arith.constant 0 : index
    %39 = vector.load %arg9[%c0_25, %c0_26, %c0_27] : memref<2x64x32xbf16, #tpu.memory_space<vmem>>, vector<1x64x32xbf16>
    %40 = vector.shape_cast %39 : vector<1x64x32xbf16> to vector<64x32xbf16>
    %c0_28 = arith.constant 0 : index
    %c0_29 = arith.constant 0 : index
    %c0_30 = arith.constant 0 : index
    %41 = vector.load %arg10[%c0_28, %c0_29, %c0_30] : memref<2x6x32xf32, #tpu.memory_space<vmem>>, vector<1x6x32xf32>
    %42 = vector.shape_cast %41 : vector<1x6x32xf32> to vector<6x32xf32>
    %43 = vector.extract_strided_slice %42 {offsets = [0, 0], sizes = [1, 32], strides = [1, 1]} : vector<6x32xf32> to vector<1x32xf32>
    %44 = vector.extract_strided_slice %42 {offsets = [1, 0], sizes = [1, 32], strides = [1, 1]} : vector<6x32xf32> to vector<1x32xf32>
    %45 = vector.extract_strided_slice %42 {offsets = [2, 0], sizes = [1, 32], strides = [1, 1]} : vector<6x32xf32> to vector<1x32xf32>
    %46 = vector.extract_strided_slice %42 {offsets = [3, 0], sizes = [1, 32], strides = [1, 1]} : vector<6x32xf32> to vector<1x32xf32>
    %47 = vector.extract_strided_slice %42 {offsets = [4, 0], sizes = [1, 32], strides = [1, 1]} : vector<6x32xf32> to vector<1x32xf32>
    %48 = vector.extract_strided_slice %42 {offsets = [5, 0], sizes = [1, 32], strides = [1, 1]} : vector<6x32xf32> to vector<1x32xf32>
    %49 = arith.truncf %25 : vector<16x32xf32> to vector<16x32xbf16>
    %cst_31 = arith.constant dense<0.000000e+00> : vector<16x96xf32>
    %50 = tpu.matmul %49, %30, %cst_31 {dimension_numbers = #tpu.dot_dimension_numbers<[1], [0], [0], [1], [0, 0, 1, 1], [], []>} : vector<16x32xbf16>, vector<32x96xbf16>, vector<16x96xf32> -> vector<16x96xf32>
    %51 = vector.broadcast %32 : vector<1x96xf32> to vector<16x96xf32>
    %52 = arith.addf %50, %51 : vector<16x96xf32>
    %53 = arith.truncf %52 : vector<16x96xf32> to vector<16x96xbf16>
    %54 = vector.extract_strided_slice %53 {offsets = [0, 0], sizes = [16, 16], strides = [1, 1]} : vector<16x96xbf16> to vector<16x16xbf16>
    %55 = vector.shape_cast %54 : vector<16x16xbf16> to vector<2x8x16xbf16>
    %56 = vector.extract_strided_slice %53 {offsets = [0, 32], sizes = [16, 16], strides = [1, 1]} : vector<16x96xbf16> to vector<16x16xbf16>
    %57 = vector.shape_cast %56 : vector<16x16xbf16> to vector<2x8x16xbf16>
    %58 = vector.extract_strided_slice %53 {offsets = [0, 64], sizes = [16, 16], strides = [1, 1]} : vector<16x96xbf16> to vector<16x16xbf16>
    %59 = vector.shape_cast %58 : vector<16x16xbf16> to vector<2x8x16xbf16>
    "tpu.trace_start"() <{level = 10 : i32, message = "bqd,bkd->bqk"}> : () -> ()
    %cst_32 = arith.constant dense<0.000000e+00> : vector<2x8x8xf32>
    %60 = tpu.matmul %55, %57, %cst_32 {dimension_numbers = #tpu.dot_dimension_numbers<[2], [2], [1], [1], [0, 0, 0, 1, 1, 1], [0], [0]>} : vector<2x8x16xbf16>, vector<2x8x16xbf16>, vector<2x8x8xf32> -> vector<2x8x8xf32>
    "tpu.trace_stop"() : () -> ()
    %61 = arith.addf %60, %28 : vector<2x8x8xf32>
    %cst_33 = arith.constant dense<0xFF800000> : vector<2x8xf32>
    %62 = vector.multi_reduction <maximumf>, %61, %cst_33 [2] : vector<2x8x8xf32> to vector<2x8xf32>
    %63 = vector.shape_cast %62 : vector<2x8xf32> to vector<2x8x1xf32>
    %64 = vector.broadcast %63 : vector<2x8x1xf32> to vector<2x8x8xf32>
    %65 = arith.subf %61, %64 : vector<2x8x8xf32>
    %66 = math.exp %65 : vector<2x8x8xf32>
    %cst_34 = arith.constant dense<0.000000e+00> : vector<2x8xf32>
    %67 = vector.multi_reduction <add>, %66, %cst_34 [2] : vector<2x8x8xf32> to vector<2x8xf32>
    %68 = vector.shape_cast %67 : vector<2x8xf32> to vector<2x8x1xf32>
    %69 = tpu.reciprocal %68 {approx = true} : vector<2x8x1xf32> -> vector<2x8x1xf32>
    %70 = vector.broadcast %69 : vector<2x8x1xf32> to vector<2x8x8xf32>
    %71 = arith.mulf %66, %70 : vector<2x8x8xf32>
    %72 = arith.truncf %71 : vector<2x8x8xf32> to vector<2x8x8xbf16>
    "tpu.trace_start"() <{level = 10 : i32, message = "bqk,bkd->bqd"}> : () -> ()
    %cst_35 = arith.constant dense<0.000000e+00> : vector<2x8x16xf32>
    %73 = tpu.matmul %72, %59, %cst_35 {dimension_numbers = #tpu.dot_dimension_numbers<[2], [1], [1], [2], [0, 0, 0, 1, 1, 2], [0], [0]>} : vector<2x8x8xbf16>, vector<2x8x16xbf16>, vector<2x8x16xf32> -> vector<2x8x16xf32>
    "tpu.trace_stop"() : () -> ()
    %74 = vector.shape_cast %73 : vector<2x8x16xf32> to vector<16x16xf32>
    %75 = vector.extract_strided_slice %53 {offsets = [0, 16], sizes = [16, 16], strides = [1, 1]} : vector<16x96xbf16> to vector<16x16xbf16>
    %76 = vector.shape_cast %75 : vector<16x16xbf16> to vector<2x8x16xbf16>
    %77 = vector.extract_strided_slice %53 {offsets = [0, 48], sizes = [16, 16], strides = [1, 1]} : vector<16x96xbf16> to vector<16x16xbf16>
    %78 = vector.shape_cast %77 : vector<16x16xbf16> to vector<2x8x16xbf16>
    %79 = vector.extract_strided_slice %53 {offsets = [0, 80], sizes = [16, 16], strides = [1, 1]} : vector<16x96xbf16> to vector<16x16xbf16>
    %80 = vector.shape_cast %79 : vector<16x16xbf16> to vector<2x8x16xbf16>
    "tpu.trace_start"() <{level = 10 : i32, message = "bqd,bkd->bqk"}> : () -> ()
    %cst_36 = arith.constant dense<0.000000e+00> : vector<2x8x8xf32>
    %81 = tpu.matmul %76, %78, %cst_36 {dimension_numbers = #tpu.dot_dimension_numbers<[2], [2], [1], [1], [0, 0, 0, 1, 1, 1], [0], [0]>} : vector<2x8x16xbf16>, vector<2x8x16xbf16>, vector<2x8x8xf32> -> vector<2x8x8xf32>
    "tpu.trace_stop"() : () -> ()
    %82 = arith.addf %81, %28 : vector<2x8x8xf32>
    %cst_37 = arith.constant dense<0xFF800000> : vector<2x8xf32>
    %83 = vector.multi_reduction <maximumf>, %82, %cst_37 [2] : vector<2x8x8xf32> to vector<2x8xf32>
    %84 = vector.shape_cast %83 : vector<2x8xf32> to vector<2x8x1xf32>
    %85 = vector.broadcast %84 : vector<2x8x1xf32> to vector<2x8x8xf32>
    %86 = arith.subf %82, %85 : vector<2x8x8xf32>
    %87 = math.exp %86 : vector<2x8x8xf32>
    %cst_38 = arith.constant dense<0.000000e+00> : vector<2x8xf32>
    %88 = vector.multi_reduction <add>, %87, %cst_38 [2] : vector<2x8x8xf32> to vector<2x8xf32>
    %89 = vector.shape_cast %88 : vector<2x8xf32> to vector<2x8x1xf32>
    %90 = tpu.reciprocal %89 {approx = true} : vector<2x8x1xf32> -> vector<2x8x1xf32>
    %91 = vector.broadcast %90 : vector<2x8x1xf32> to vector<2x8x8xf32>
    %92 = arith.mulf %87, %91 : vector<2x8x8xf32>
    %93 = arith.truncf %92 : vector<2x8x8xf32> to vector<2x8x8xbf16>
    "tpu.trace_start"() <{level = 10 : i32, message = "bqk,bkd->bqd"}> : () -> ()
    %cst_39 = arith.constant dense<0.000000e+00> : vector<2x8x16xf32>
    %94 = tpu.matmul %93, %80, %cst_39 {dimension_numbers = #tpu.dot_dimension_numbers<[2], [1], [1], [2], [0, 0, 0, 1, 1, 2], [0], [0]>} : vector<2x8x8xbf16>, vector<2x8x16xbf16>, vector<2x8x16xf32> -> vector<2x8x16xf32>
    "tpu.trace_stop"() : () -> ()
    %95 = vector.shape_cast %94 : vector<2x8x16xf32> to vector<16x16xf32>
    %96 = tpu.concatenate %74, %95 in 1 : vector<16x16xf32>, vector<16x16xf32> -> vector<16x32xf32>
    %97 = arith.truncf %96 : vector<16x32xf32> to vector<16x32xbf16>
    %cst_40 = arith.constant dense<0.000000e+00> : vector<16x32xf32>
    %98 = tpu.matmul %97, %34, %cst_40 {dimension_numbers = #tpu.dot_dimension_numbers<[1], [0], [0], [1], [0, 0, 1, 1], [], []>} : vector<16x32xbf16>, vector<32x32xbf16>, vector<16x32xf32> -> vector<16x32xf32>
    %99 = vector.broadcast %43 : vector<1x32xf32> to vector<16x32xf32>
    %100 = arith.addf %98, %99 : vector<16x32xf32>
    %101 = arith.addf %25, %100 : vector<16x32xf32>
    %cst_41 = arith.constant dense<0.000000e+00> : vector<16xf32>
    %102 = vector.multi_reduction <add>, %101, %cst_41 [1] : vector<16x32xf32> to vector<16xf32>
    %103 = vector.shape_cast %102 : vector<16xf32> to vector<16x1xf32>
    %cst_42 = arith.constant 3.200000e+01 : f32
    %104 = vector.broadcast %cst_42 : f32 to vector<16x1xf32>
    %105 = arith.divf %103, %104 : vector<16x1xf32>
    %106 = vector.broadcast %105 : vector<16x1xf32> to vector<16x32xf32>
    %107 = arith.subf %101, %106 : vector<16x32xf32>
    %108 = arith.mulf %107, %107 : vector<16x32xf32>
    %cst_43 = arith.constant dense<0.000000e+00> : vector<16xf32>
    %109 = vector.multi_reduction <add>, %108, %cst_43 [1] : vector<16x32xf32> to vector<16xf32>
    %110 = vector.shape_cast %109 : vector<16xf32> to vector<16x1xf32>
    %cst_44 = arith.constant 3.200000e+01 : f32
    %111 = vector.broadcast %cst_44 : f32 to vector<16x1xf32>
    %112 = arith.divf %110, %111 : vector<16x1xf32>
    %113 = vector.broadcast %105 : vector<16x1xf32> to vector<16x32xf32>
    %114 = arith.subf %101, %113 : vector<16x32xf32>
    %cst_45 = arith.constant 9.99999974E-6 : f32
    %115 = vector.broadcast %cst_45 : f32 to vector<16x1xf32>
    %116 = arith.addf %112, %115 : vector<16x1xf32>
    %117 = math.rsqrt %116 : vector<16x1xf32>
    %118 = vector.broadcast %117 : vector<16x1xf32> to vector<16x32xf32>
    %119 = arith.mulf %114, %118 : vector<16x32xf32>
    %120 = vector.broadcast %45 : vector<1x32xf32> to vector<16x32xf32>
    %121 = arith.mulf %119, %120 : vector<16x32xf32>
    %122 = vector.broadcast %46 : vector<1x32xf32> to vector<16x32xf32>
    %123 = arith.addf %121, %122 : vector<16x32xf32>
    %124 = arith.truncf %123 : vector<16x32xf32> to vector<16x32xbf16>
    %cst_46 = arith.constant dense<0.000000e+00> : vector<16x64xf32>
    %125 = tpu.matmul %124, %36, %cst_46 {dimension_numbers = #tpu.dot_dimension_numbers<[1], [0], [0], [1], [0, 0, 1, 1], [], []>} : vector<16x32xbf16>, vector<32x64xbf16>, vector<16x64xf32> -> vector<16x64xf32>
    %126 = vector.broadcast %38 : vector<1x64xf32> to vector<16x64xf32>
    %127 = arith.addf %125, %126 : vector<16x64xf32>
    %cst_47 = arith.constant 5.000000e-01 : f32
    %128 = vector.broadcast %cst_47 : f32 to vector<16x64xf32>
    %129 = arith.mulf %128, %127 : vector<16x64xf32>
    %cst_48 = arith.constant 4.471500e-02 : f32
    %130 = vector.broadcast %cst_48 : f32 to vector<16x64xf32>
    %131 = arith.mulf %130, %127 : vector<16x64xf32>
    %132 = arith.mulf %131, %127 : vector<16x64xf32>
    %133 = arith.mulf %132, %127 : vector<16x64xf32>
    %134 = arith.addf %127, %133 : vector<16x64xf32>
    %cst_49 = arith.constant 0.797884583 : f32
    %135 = vector.broadcast %cst_49 : f32 to vector<16x64xf32>
    %136 = arith.mulf %135, %134 : vector<16x64xf32>
    %137 = math.tanh %136 : vector<16x64xf32>
    %cst_50 = arith.constant 1.000000e+00 : f32
    %138 = vector.broadcast %cst_50 : f32 to vector<16x64xf32>
    %139 = arith.addf %138, %137 : vector<16x64xf32>
    %140 = arith.mulf %129, %139 : vector<16x64xf32>
    %141 = arith.truncf %140 : vector<16x64xf32> to vector<16x64xbf16>
    %cst_51 = arith.constant dense<0.000000e+00> : vector<16x32xf32>
    %142 = tpu.matmul %141, %40, %cst_51 {dimension_numbers = #tpu.dot_dimension_numbers<[1], [0], [0], [1], [0, 0, 1, 1], [], []>} : vector<16x64xbf16>, vector<64x32xbf16>, vector<16x32xf32> -> vector<16x32xf32>
    %143 = vector.broadcast %44 : vector<1x32xf32> to vector<16x32xf32>
    %144 = arith.addf %142, %143 : vector<16x32xf32>
    %145 = arith.addf %123, %144 : vector<16x32xf32>
    %cst_52 = arith.constant dense<0.000000e+00> : vector<16xf32>
    %146 = vector.multi_reduction <add>, %145, %cst_52 [1] : vector<16x32xf32> to vector<16xf32>
    %147 = vector.shape_cast %146 : vector<16xf32> to vector<16x1xf32>
    %cst_53 = arith.constant 3.200000e+01 : f32
    %148 = vector.broadcast %cst_53 : f32 to vector<16x1xf32>
    %149 = arith.divf %147, %148 : vector<16x1xf32>
    %150 = vector.broadcast %149 : vector<16x1xf32> to vector<16x32xf32>
    %151 = arith.subf %145, %150 : vector<16x32xf32>
    %152 = arith.mulf %151, %151 : vector<16x32xf32>
    %cst_54 = arith.constant dense<0.000000e+00> : vector<16xf32>
    %153 = vector.multi_reduction <add>, %152, %cst_54 [1] : vector<16x32xf32> to vector<16xf32>
    %154 = vector.shape_cast %153 : vector<16xf32> to vector<16x1xf32>
    %cst_55 = arith.constant 3.200000e+01 : f32
    %155 = vector.broadcast %cst_55 : f32 to vector<16x1xf32>
    %156 = arith.divf %154, %155 : vector<16x1xf32>
    %157 = vector.broadcast %149 : vector<16x1xf32> to vector<16x32xf32>
    %158 = arith.subf %145, %157 : vector<16x32xf32>
    %cst_56 = arith.constant 9.99999974E-6 : f32
    %159 = vector.broadcast %cst_56 : f32 to vector<16x1xf32>
    %160 = arith.addf %156, %159 : vector<16x1xf32>
    %161 = math.rsqrt %160 : vector<16x1xf32>
    %162 = vector.broadcast %161 : vector<16x1xf32> to vector<16x32xf32>
    %163 = arith.mulf %158, %162 : vector<16x32xf32>
    %164 = vector.broadcast %47 : vector<1x32xf32> to vector<16x32xf32>
    %165 = arith.mulf %163, %164 : vector<16x32xf32>
    %166 = vector.broadcast %48 : vector<1x32xf32> to vector<16x32xf32>
    %167 = arith.addf %165, %166 : vector<16x32xf32>
    %c1 = arith.constant 1 : index
    %c0_57 = arith.constant 0 : index
    %c0_58 = arith.constant 0 : index
    %168 = vector.load %arg4[%c1, %c0_57, %c0_58] : memref<2x32x96xbf16, #tpu.memory_space<vmem>>, vector<1x32x96xbf16>
    %169 = vector.shape_cast %168 : vector<1x32x96xbf16> to vector<32x96xbf16>
    %c1_59 = arith.constant 1 : index
    %c0_60 = arith.constant 0 : index
    %c0_61 = arith.constant 0 : index
    %170 = vector.load %arg5[%c1_59, %c0_60, %c0_61] : memref<2x1x96xf32, #tpu.memory_space<vmem>>, vector<1x1x96xf32>
    %171 = vector.shape_cast %170 : vector<1x1x96xf32> to vector<1x96xf32>
    %c1_62 = arith.constant 1 : index
    %c0_63 = arith.constant 0 : index
    %c0_64 = arith.constant 0 : index
    %172 = vector.load %arg6[%c1_62, %c0_63, %c0_64] : memref<2x32x32xbf16, #tpu.memory_space<vmem>>, vector<1x32x32xbf16>
    %173 = vector.shape_cast %172 : vector<1x32x32xbf16> to vector<32x32xbf16>
    %c1_65 = arith.constant 1 : index
    %c0_66 = arith.constant 0 : index
    %c0_67 = arith.constant 0 : index
    %174 = vector.load %arg7[%c1_65, %c0_66, %c0_67] : memref<2x32x64xbf16, #tpu.memory_space<vmem>>, vector<1x32x64xbf16>
    %175 = vector.shape_cast %174 : vector<1x32x64xbf16> to vector<32x64xbf16>
    %c1_68 = arith.constant 1 : index
    %c0_69 = arith.constant 0 : index
    %c0_70 = arith.constant 0 : index
    %176 = vector.load %arg8[%c1_68, %c0_69, %c0_70] : memref<2x1x64xf32, #tpu.memory_space<vmem>>, vector<1x1x64xf32>
    %177 = vector.shape_cast %176 : vector<1x1x64xf32> to vector<1x64xf32>
    %c1_71 = arith.constant 1 : index
    %c0_72 = arith.constant 0 : index
    %c0_73 = arith.constant 0 : index
    %178 = vector.load %arg9[%c1_71, %c0_72, %c0_73] : memref<2x64x32xbf16, #tpu.memory_space<vmem>>, vector<1x64x32xbf16>
    %179 = vector.shape_cast %178 : vector<1x64x32xbf16> to vector<64x32xbf16>
    %c1_74 = arith.constant 1 : index
    %c0_75 = arith.constant 0 : index
    %c0_76 = arith.constant 0 : index
    %180 = vector.load %arg10[%c1_74, %c0_75, %c0_76] : memref<2x6x32xf32, #tpu.memory_space<vmem>>, vector<1x6x32xf32>
    %181 = vector.shape_cast %180 : vector<1x6x32xf32> to vector<6x32xf32>
    %182 = vector.extract_strided_slice %181 {offsets = [0, 0], sizes = [1, 32], strides = [1, 1]} : vector<6x32xf32> to vector<1x32xf32>
    %183 = vector.extract_strided_slice %181 {offsets = [1, 0], sizes = [1, 32], strides = [1, 1]} : vector<6x32xf32> to vector<1x32xf32>
    %184 = vector.extract_strided_slice %181 {offsets = [2, 0], sizes = [1, 32], strides = [1, 1]} : vector<6x32xf32> to vector<1x32xf32>
    %185 = vector.extract_strided_slice %181 {offsets = [3, 0], sizes = [1, 32], strides = [1, 1]} : vector<6x32xf32> to vector<1x32xf32>
    %186 = vector.extract_strided_slice %181 {offsets = [4, 0], sizes = [1, 32], strides = [1, 1]} : vector<6x32xf32> to vector<1x32xf32>
    %187 = vector.extract_strided_slice %181 {offsets = [5, 0], sizes = [1, 32], strides = [1, 1]} : vector<6x32xf32> to vector<1x32xf32>
    %188 = arith.truncf %167 : vector<16x32xf32> to vector<16x32xbf16>
    %cst_77 = arith.constant dense<0.000000e+00> : vector<16x96xf32>
    %189 = tpu.matmul %188, %169, %cst_77 {dimension_numbers = #tpu.dot_dimension_numbers<[1], [0], [0], [1], [0, 0, 1, 1], [], []>} : vector<16x32xbf16>, vector<32x96xbf16>, vector<16x96xf32> -> vector<16x96xf32>
    %190 = vector.broadcast %171 : vector<1x96xf32> to vector<16x96xf32>
    %191 = arith.addf %189, %190 : vector<16x96xf32>
    %192 = arith.truncf %191 : vector<16x96xf32> to vector<16x96xbf16>
    %193 = vector.extract_strided_slice %192 {offsets = [0, 0], sizes = [16, 16], strides = [1, 1]} : vector<16x96xbf16> to vector<16x16xbf16>
    %194 = vector.shape_cast %193 : vector<16x16xbf16> to vector<2x8x16xbf16>
    %195 = vector.extract_strided_slice %192 {offsets = [0, 32], sizes = [16, 16], strides = [1, 1]} : vector<16x96xbf16> to vector<16x16xbf16>
    %196 = vector.shape_cast %195 : vector<16x16xbf16> to vector<2x8x16xbf16>
    %197 = vector.extract_strided_slice %192 {offsets = [0, 64], sizes = [16, 16], strides = [1, 1]} : vector<16x96xbf16> to vector<16x16xbf16>
    %198 = vector.shape_cast %197 : vector<16x16xbf16> to vector<2x8x16xbf16>
    "tpu.trace_start"() <{level = 10 : i32, message = "bqd,bkd->bqk"}> : () -> ()
    %cst_78 = arith.constant dense<0.000000e+00> : vector<2x8x8xf32>
    %199 = tpu.matmul %194, %196, %cst_78 {dimension_numbers = #tpu.dot_dimension_numbers<[2], [2], [1], [1], [0, 0, 0, 1, 1, 1], [0], [0]>} : vector<2x8x16xbf16>, vector<2x8x16xbf16>, vector<2x8x8xf32> -> vector<2x8x8xf32>
    "tpu.trace_stop"() : () -> ()
    %200 = arith.addf %199, %28 : vector<2x8x8xf32>
    %cst_79 = arith.constant dense<0xFF800000> : vector<2x8xf32>
    %201 = vector.multi_reduction <maximumf>, %200, %cst_79 [2] : vector<2x8x8xf32> to vector<2x8xf32>
    %202 = vector.shape_cast %201 : vector<2x8xf32> to vector<2x8x1xf32>
    %203 = vector.broadcast %202 : vector<2x8x1xf32> to vector<2x8x8xf32>
    %204 = arith.subf %200, %203 : vector<2x8x8xf32>
    %205 = math.exp %204 : vector<2x8x8xf32>
    %cst_80 = arith.constant dense<0.000000e+00> : vector<2x8xf32>
    %206 = vector.multi_reduction <add>, %205, %cst_80 [2] : vector<2x8x8xf32> to vector<2x8xf32>
    %207 = vector.shape_cast %206 : vector<2x8xf32> to vector<2x8x1xf32>
    %208 = tpu.reciprocal %207 {approx = true} : vector<2x8x1xf32> -> vector<2x8x1xf32>
    %209 = vector.broadcast %208 : vector<2x8x1xf32> to vector<2x8x8xf32>
    %210 = arith.mulf %205, %209 : vector<2x8x8xf32>
    %211 = arith.truncf %210 : vector<2x8x8xf32> to vector<2x8x8xbf16>
    "tpu.trace_start"() <{level = 10 : i32, message = "bqk,bkd->bqd"}> : () -> ()
    %cst_81 = arith.constant dense<0.000000e+00> : vector<2x8x16xf32>
    %212 = tpu.matmul %211, %198, %cst_81 {dimension_numbers = #tpu.dot_dimension_numbers<[2], [1], [1], [2], [0, 0, 0, 1, 1, 2], [0], [0]>} : vector<2x8x8xbf16>, vector<2x8x16xbf16>, vector<2x8x16xf32> -> vector<2x8x16xf32>
    "tpu.trace_stop"() : () -> ()
    %213 = vector.shape_cast %212 : vector<2x8x16xf32> to vector<16x16xf32>
    %214 = vector.extract_strided_slice %192 {offsets = [0, 16], sizes = [16, 16], strides = [1, 1]} : vector<16x96xbf16> to vector<16x16xbf16>
    %215 = vector.shape_cast %214 : vector<16x16xbf16> to vector<2x8x16xbf16>
    %216 = vector.extract_strided_slice %192 {offsets = [0, 48], sizes = [16, 16], strides = [1, 1]} : vector<16x96xbf16> to vector<16x16xbf16>
    %217 = vector.shape_cast %216 : vector<16x16xbf16> to vector<2x8x16xbf16>
    %218 = vector.extract_strided_slice %192 {offsets = [0, 80], sizes = [16, 16], strides = [1, 1]} : vector<16x96xbf16> to vector<16x16xbf16>
    %219 = vector.shape_cast %218 : vector<16x16xbf16> to vector<2x8x16xbf16>
    "tpu.trace_start"() <{level = 10 : i32, message = "bqd,bkd->bqk"}> : () -> ()
    %cst_82 = arith.constant dense<0.000000e+00> : vector<2x8x8xf32>
    %220 = tpu.matmul %215, %217, %cst_82 {dimension_numbers = #tpu.dot_dimension_numbers<[2], [2], [1], [1], [0, 0, 0, 1, 1, 1], [0], [0]>} : vector<2x8x16xbf16>, vector<2x8x16xbf16>, vector<2x8x8xf32> -> vector<2x8x8xf32>
    "tpu.trace_stop"() : () -> ()
    %221 = arith.addf %220, %28 : vector<2x8x8xf32>
    %cst_83 = arith.constant dense<0xFF800000> : vector<2x8xf32>
    %222 = vector.multi_reduction <maximumf>, %221, %cst_83 [2] : vector<2x8x8xf32> to vector<2x8xf32>
    %223 = vector.shape_cast %222 : vector<2x8xf32> to vector<2x8x1xf32>
    %224 = vector.broadcast %223 : vector<2x8x1xf32> to vector<2x8x8xf32>
    %225 = arith.subf %221, %224 : vector<2x8x8xf32>
    %226 = math.exp %225 : vector<2x8x8xf32>
    %cst_84 = arith.constant dense<0.000000e+00> : vector<2x8xf32>
    %227 = vector.multi_reduction <add>, %226, %cst_84 [2] : vector<2x8x8xf32> to vector<2x8xf32>
    %228 = vector.shape_cast %227 : vector<2x8xf32> to vector<2x8x1xf32>
    %229 = tpu.reciprocal %228 {approx = true} : vector<2x8x1xf32> -> vector<2x8x1xf32>
    %230 = vector.broadcast %229 : vector<2x8x1xf32> to vector<2x8x8xf32>
    %231 = arith.mulf %226, %230 : vector<2x8x8xf32>
    %232 = arith.truncf %231 : vector<2x8x8xf32> to vector<2x8x8xbf16>
    "tpu.trace_start"() <{level = 10 : i32, message = "bqk,bkd->bqd"}> : () -> ()
    %cst_85 = arith.constant dense<0.000000e+00> : vector<2x8x16xf32>
    %233 = tpu.matmul %232, %219, %cst_85 {dimension_numbers = #tpu.dot_dimension_numbers<[2], [1], [1], [2], [0, 0, 0, 1, 1, 2], [0], [0]>} : vector<2x8x8xbf16>, vector<2x8x16xbf16>, vector<2x8x16xf32> -> vector<2x8x16xf32>
    "tpu.trace_stop"() : () -> ()
    %234 = vector.shape_cast %233 : vector<2x8x16xf32> to vector<16x16xf32>
    %235 = tpu.concatenate %213, %234 in 1 : vector<16x16xf32>, vector<16x16xf32> -> vector<16x32xf32>
    %236 = arith.truncf %235 : vector<16x32xf32> to vector<16x32xbf16>
    %cst_86 = arith.constant dense<0.000000e+00> : vector<16x32xf32>
    %237 = tpu.matmul %236, %173, %cst_86 {dimension_numbers = #tpu.dot_dimension_numbers<[1], [0], [0], [1], [0, 0, 1, 1], [], []>} : vector<16x32xbf16>, vector<32x32xbf16>, vector<16x32xf32> -> vector<16x32xf32>
    %238 = vector.broadcast %182 : vector<1x32xf32> to vector<16x32xf32>
    %239 = arith.addf %237, %238 : vector<16x32xf32>
    %240 = arith.addf %167, %239 : vector<16x32xf32>
    %cst_87 = arith.constant dense<0.000000e+00> : vector<16xf32>
    %241 = vector.multi_reduction <add>, %240, %cst_87 [1] : vector<16x32xf32> to vector<16xf32>
    %242 = vector.shape_cast %241 : vector<16xf32> to vector<16x1xf32>
    %cst_88 = arith.constant 3.200000e+01 : f32
    %243 = vector.broadcast %cst_88 : f32 to vector<16x1xf32>
    %244 = arith.divf %242, %243 : vector<16x1xf32>
    %245 = vector.broadcast %244 : vector<16x1xf32> to vector<16x32xf32>
    %246 = arith.subf %240, %245 : vector<16x32xf32>
    %247 = arith.mulf %246, %246 : vector<16x32xf32>
    %cst_89 = arith.constant dense<0.000000e+00> : vector<16xf32>
    %248 = vector.multi_reduction <add>, %247, %cst_89 [1] : vector<16x32xf32> to vector<16xf32>
    %249 = vector.shape_cast %248 : vector<16xf32> to vector<16x1xf32>
    %cst_90 = arith.constant 3.200000e+01 : f32
    %250 = vector.broadcast %cst_90 : f32 to vector<16x1xf32>
    %251 = arith.divf %249, %250 : vector<16x1xf32>
    %252 = vector.broadcast %244 : vector<16x1xf32> to vector<16x32xf32>
    %253 = arith.subf %240, %252 : vector<16x32xf32>
    %cst_91 = arith.constant 9.99999974E-6 : f32
    %254 = vector.broadcast %cst_91 : f32 to vector<16x1xf32>
    %255 = arith.addf %251, %254 : vector<16x1xf32>
    %256 = math.rsqrt %255 : vector<16x1xf32>
    %257 = vector.broadcast %256 : vector<16x1xf32> to vector<16x32xf32>
    %258 = arith.mulf %253, %257 : vector<16x32xf32>
    %259 = vector.broadcast %184 : vector<1x32xf32> to vector<16x32xf32>
    %260 = arith.mulf %258, %259 : vector<16x32xf32>
    %261 = vector.broadcast %185 : vector<1x32xf32> to vector<16x32xf32>
    %262 = arith.addf %260, %261 : vector<16x32xf32>
    %263 = arith.truncf %262 : vector<16x32xf32> to vector<16x32xbf16>
    %cst_92 = arith.constant dense<0.000000e+00> : vector<16x64xf32>
    %264 = tpu.matmul %263, %175, %cst_92 {dimension_numbers = #tpu.dot_dimension_numbers<[1], [0], [0], [1], [0, 0, 1, 1], [], []>} : vector<16x32xbf16>, vector<32x64xbf16>, vector<16x64xf32> -> vector<16x64xf32>
    %265 = vector.broadcast %177 : vector<1x64xf32> to vector<16x64xf32>
    %266 = arith.addf %264, %265 : vector<16x64xf32>
    %cst_93 = arith.constant 5.000000e-01 : f32
    %267 = vector.broadcast %cst_93 : f32 to vector<16x64xf32>
    %268 = arith.mulf %267, %266 : vector<16x64xf32>
    %cst_94 = arith.constant 4.471500e-02 : f32
    %269 = vector.broadcast %cst_94 : f32 to vector<16x64xf32>
    %270 = arith.mulf %269, %266 : vector<16x64xf32>
    %271 = arith.mulf %270, %266 : vector<16x64xf32>
    %272 = arith.mulf %271, %266 : vector<16x64xf32>
    %273 = arith.addf %266, %272 : vector<16x64xf32>
    %cst_95 = arith.constant 0.797884583 : f32
    %274 = vector.broadcast %cst_95 : f32 to vector<16x64xf32>
    %275 = arith.mulf %274, %273 : vector<16x64xf32>
    %276 = math.tanh %275 : vector<16x64xf32>
    %cst_96 = arith.constant 1.000000e+00 : f32
    %277 = vector.broadcast %cst_96 : f32 to vector<16x64xf32>
    %278 = arith.addf %277, %276 : vector<16x64xf32>
    %279 = arith.mulf %268, %278 : vector<16x64xf32>
    %280 = arith.truncf %279 : vector<16x64xf32> to vector<16x64xbf16>
    %cst_97 = arith.constant dense<0.000000e+00> : vector<16x32xf32>
    %281 = tpu.matmul %280, %179, %cst_97 {dimension_numbers = #tpu.dot_dimension_numbers<[1], [0], [0], [1], [0, 0, 1, 1], [], []>} : vector<16x64xbf16>, vector<64x32xbf16>, vector<16x32xf32> -> vector<16x32xf32>
    %282 = vector.broadcast %183 : vector<1x32xf32> to vector<16x32xf32>
    %283 = arith.addf %281, %282 : vector<16x32xf32>
    %284 = arith.addf %262, %283 : vector<16x32xf32>
    %cst_98 = arith.constant dense<0.000000e+00> : vector<16xf32>
    %285 = vector.multi_reduction <add>, %284, %cst_98 [1] : vector<16x32xf32> to vector<16xf32>
    %286 = vector.shape_cast %285 : vector<16xf32> to vector<16x1xf32>
    %cst_99 = arith.constant 3.200000e+01 : f32
    %287 = vector.broadcast %cst_99 : f32 to vector<16x1xf32>
    %288 = arith.divf %286, %287 : vector<16x1xf32>
    %289 = vector.broadcast %288 : vector<16x1xf32> to vector<16x32xf32>
    %290 = arith.subf %284, %289 : vector<16x32xf32>
    %291 = arith.mulf %290, %290 : vector<16x32xf32>
    %cst_100 = arith.constant dense<0.000000e+00> : vector<16xf32>
    %292 = vector.multi_reduction <add>, %291, %cst_100 [1] : vector<16x32xf32> to vector<16xf32>
    %293 = vector.shape_cast %292 : vector<16xf32> to vector<16x1xf32>
    %cst_101 = arith.constant 3.200000e+01 : f32
    %294 = vector.broadcast %cst_101 : f32 to vector<16x1xf32>
    %295 = arith.divf %293, %294 : vector<16x1xf32>
    %296 = vector.broadcast %288 : vector<16x1xf32> to vector<16x32xf32>
    %297 = arith.subf %284, %296 : vector<16x32xf32>
    %cst_102 = arith.constant 9.99999974E-6 : f32
    %298 = vector.broadcast %cst_102 : f32 to vector<16x1xf32>
    %299 = arith.addf %295, %298 : vector<16x1xf32>
    %300 = math.rsqrt %299 : vector<16x1xf32>
    %301 = vector.broadcast %300 : vector<16x1xf32> to vector<16x32xf32>
    %302 = arith.mulf %297, %301 : vector<16x32xf32>
    %303 = vector.broadcast %186 : vector<1x32xf32> to vector<16x32xf32>
    %304 = arith.mulf %302, %303 : vector<16x32xf32>
    %305 = vector.broadcast %187 : vector<1x32xf32> to vector<16x32xf32>
    %306 = arith.addf %304, %305 : vector<16x32xf32>
    %c0_103 = arith.constant 0 : index
    %c0_104 = arith.constant 0 : index
    %307 = vector.load %arg11[%c0_103, %c0_104] : memref<16x32xf32, #tpu.memory_space<vmem>>, vector<16x32xf32>
    tpu.vector_store %arg11[%c0_103, %c0_104], %306 {strides = array<i32>} : memref<16x32xf32, #tpu.memory_space<vmem>>, vector<16x32xf32>,
    return
  }
  func.func @transform_0(%arg0: i32) -> (i32, i32) {
    %c0_i32 = arith.constant 0 : i32
    %c0_i32_0 = arith.constant 0 : i32
    %c0_i32_1 = arith.constant 0 : i32
    return %c0_i32, %c0_i32_0 : i32, i32
  }
  func.func @transform_1(%arg0: i32) -> (i32, i32, i32) {
    %c0_i32 = arith.constant 0 : i32
    %c0_i32_0 = arith.constant 0 : i32
    %c0_i32_1 = arith.constant 0 : i32
    %c0_i32_2 = arith.constant 0 : i32
    return %c0_i32, %c0_i32_0, %c0_i32_1 : i32, i32, i32
  }
  func.func @transform_2(%arg0: i32) -> (i32, i32) {
    %c0_i32 = arith.constant 0 : i32
    %c0_i32_0 = arith.constant 0 : i32
    %c0_i32_1 = arith.constant 0 : i32
    return %c0_i32, %c0_i32_0 : i32, i32
  }
  func.func @transform_3(%arg0: i32) -> (i32, i32, i32) {
    %c0_i32 = arith.constant 0 : i32
    %c0_i32_0 = arith.constant 0 : i32
    %c0_i32_1 = arith.constant 0 : i32
    %c0_i32_2 = arith.constant 0 : i32
    return %c0_i32, %c0_i32_0, %c0_i32_1 : i32, i32, i32
  }
  func.func @transform_4(%arg0: i32) -> (i32, i32, i32) {
    %c0_i32 = arith.constant 0 : i32
    %c0_i32_0 = arith.constant 0 : i32
    %c0_i32_1 = arith.constant 0 : i32
    %c0_i32_2 = arith.constant 0 : i32
    return %c0_i32, %c0_i32_0, %c0_i32_1 : i32, i32, i32
  }
  func.func @transform_5(%arg0: i32) -> (i32, i32, i32) {
    %c0_i32 = arith.constant 0 : i32
    %c0_i32_0 = arith.constant 0 : i32
    %c0_i32_1 = arith.constant 0 : i32
    %c0_i32_2 = arith.constant 0 : i32
    return %c0_i32, %c0_i32_0, %c0_i32_1 : i32, i32, i32
  }
  func.func @transform_6(%arg0: i32) -> (i32, i32, i32) {
    %c0_i32 = arith.constant 0 : i32
    %c0_i32_0 = arith.constant 0 : i32
    %c0_i32_1 = arith.constant 0 : i32
    %c0_i32_2 = arith.constant 0 : i32
    return %c0_i32, %c0_i32_0, %c0_i32_1 : i32, i32, i32
  }
  func.func @transform_7(%arg0: i32) -> (i32, i32, i32) {
    %c0_i32 = arith.constant 0 : i32
    %c0_i32_0 = arith.constant 0 : i32
    %c0_i32_1 = arith.constant 0 : i32
    %c0_i32_2 = arith.constant 0 : i32
    return %c0_i32, %c0_i32_0, %c0_i32_1 : i32, i32, i32
  }
  func.func @transform_8(%arg0: i32) -> (i32, i32, i32) {
    %c0_i32 = arith.constant 0 : i32
    %c0_i32_0 = arith.constant 0 : i32
    %c0_i32_1 = arith.constant 0 : i32
    %c0_i32_2 = arith.constant 0 : i32
    return %c0_i32, %c0_i32_0, %c0_i32_1 : i32, i32, i32
  }
  func.func @transform_9(%arg0: i32) -> (i32, i32, i32) {
    %c0_i32 = arith.constant 0 : i32
    %c0_i32_0 = arith.constant 0 : i32
    %c0_i32_1 = arith.constant 0 : i32
    %c0_i32_2 = arith.constant 0 : i32
    return %c0_i32, %c0_i32_0, %c0_i32_1 : i32, i32, i32
  }
  func.func @transform_10(%arg0: i32) -> (i32, i32) {
    %c0_i32 = arith.constant 0 : i32
    %c0_i32_0 = arith.constant 0 : i32
    %c0_i32_1 = arith.constant 0 : i32
    return %c0_i32, %c0_i32_0 : i32, i32
  }
}

</mosaic_0001>

<bundles_post_ra>
// kernel: roberta_encoder_forward.1
= control target key start
LH: loop header
LB: loop body
LE: loop exit
PB: predicated region body
PF: predicated region fallthrough
CT: control target
= control target key end

     0   :  { %vm40_vm0 = vcmask 261120   ;;  %s2704_s0 = inlined_call_operand.vmem [shape: f32[16,32], index: 0, kind: input, shape index: {}]   ;;  %s2705_s1 = inlined_call_operand.vmem [shape: f32[2,1,8], index: 1, kind: input, shape index: {}]   ;;  %s2706_s2 = inlined_call_operand.vmem [shape: f32[2,32], index: 2, kind: input, shape index: {}]   ;;  %s2707_s3 = inlined_call_operand.vmem [shape: bf16[2,32,96], index: 3, kind: input, shape index: {}]   ;;  %s2708_s4 = inlined_call_operand.vmem [shape: f32[2,1,96], index: 4, kind: input, shape index: {}]   ;;  %s2709_s5 = inlined_call_operand.vmem [shape: bf16[2,32,32], index: 5, kind: input, shape index: {}]   ;;  %s2710_s6 = inlined_call_operand.vmem [shape: bf16[2,32,64], index: 6, kind: input, shape index: {}]   ;;  %s2711_s7 = inlined_call_operand.vmem [shape: f32[2,1,64], index: 7, kind: input, shape index: {}]   ;;  %s2712_s8 = inlined_call_operand.vmem [shape: bf16[2,64,32], index: 8, kind: input, shape index: {}]   ;;  %s2713_s9 = inlined_call_operand.vmem [shape: f32[2,6,32], index: 9, kind: input, shape index: {}]   ;;  %s2714_s10 = inlined_call_operand.hbm [shape: f32[16,32], index: 10, kind: output, shape index: {}]  }
   0x1   :  { %v38_v0 = vld [vmem:[%s2704_s0] sm:$0xff]  ;;  %v39_v1 = vld [vmem:[%s2704_s0 + $0x8] sm:$0xff] }
   0x2   :  { %v41_v2 = vsel %vm40_vm0, %v38_v0, 0.0  ;;  %v44_v3 = vsel %vm40_vm0, %v39_v1, 0.0 }
   0x3   :  { %42 = vadd.xlane.f32.xlu0 %v41_v2 }
   0x7   :  { %45 = vadd.xlane.f32.xlu0 %v44_v3 }
   0x8   :  { %15 = vsyncpa [#allocation3], 0  ;;  %v2119_v14 = vld [vmem:[%s2707_s3] sm:$0xff]   ;;  %v2223_v15 = vmov 0.0   ;;  %v2120_v16 = vld [vmem:[%s2707_s3 + $0x8] sm:$0xff]   ;;  %vm2224_vm1 = vmmov 0   ;;  %v68_v21 = vlaneseq }
   0x9   :  { %1930 = vmatprep.subr.bf16.mxu1 %v2223_v15  ;;  %1944 = vmatprep.subr.bf16.mxu0 %v2223_v15  ;;  %v37_v26 = vld [vmem:[%s2706_s2] sm:$0x3]  ;;  %s2225_s23 = smov 96   ;;  %vm188_vm2 = vcmask 130048   ;;  %vm283_vm3 = vcmask 64512   ;;  %s2227_s28 = smov 80  }
   0xa   :  { %1931 = vmatpush3.bf16.msra.mxu1 %v2119_v14  ;;  %1934 = vmatprep.mubr.msk.bf16.mxu1 %vm2224_vm1, %v2223_v15  ;;  %v2313_v24 = vshrl.u32 %v68_v21, 7  ;;  %v1791_v39 = vld [vmem:[%s2708_s4] ss:$0 sm:$0xff]  ;;  %v2366_v54 = vld [vmem:[%s2705_s1 + $0x1] ss:$0 sm:$0xff]  ;;  %vm313_vm4 = vcmask 1043456  }
   0xb   :  { %1932 = vmatprep.subr.bf16.mxu1 %v2223_v15  ;;  %1946 = vmatprep.mubr.msk.bf16.mxu0 %vm2224_vm1, %v2223_v15  ;;  %v2361_v52 = vld [vmem:[%s2705_s1] ss:$0 sm:$0xff]  ;;  %s2226_s1 = smov 64   ;;  %s2228_s29 = smov 112   ;;  %vm846_vm5 = vcmask 523264  }
   0xc   :  { %v2316_v25 = vsub.s32 0, %v2313_v24  ;;  %v2323_v30 = vsub.s32 1, %v2313_v24  ;;  %s2229_s30 = smov 48   ;;  %s2230_s15 = smov 16  }
   0xe   :  { %1933 = vmatpush3.bf16.msra.mxu1 %v2120_v16  ;;  %v71_v29 = vrot.slane %v37_v26, %v2316_v25  ;;  %v77_v34 = vrot.slane %v37_v26, %v2323_v30 }
   0xf   :  { %1938 = vmatprep.subr.bf16.mxu1 %v2223_v15 }
  0x90   :  { %v43_v4 = vpop.xlane.xlu0 %42 }
  0x91   :  { %v48_v5 = vmul.f32 0.03125, %v43_v4 }
  0x93   :  { %v50_v6 = vsub.f32 %v38_v0, %v48_v5 }
  0x94   :  { %v46_v7 = vpop.xlane.xlu0 %45 }
  0x95   :  { %v49_v8 = vmul.f32 0.03125, %v46_v7  ;;  %v52_v9 = vmul.f32 %v50_v6, %v50_v6 }
  0x97   :  { %v51_v10 = vsub.f32 %v39_v1, %v49_v8  ;;  %v54_v11 = vsel %vm40_vm0, %v52_v9, 0.0 }
  0x98   :  { %55 = vadd.xlane.f32.xlu1 %v54_v11 }
  0x99   :  { %v53_v12 = vmul.f32 %v51_v10, %v51_v10 }
  0x9b   :  { %v57_v13 = vsel %vm40_vm0, %v53_v12, 0.0 }
  0x9c   :  { %58 = vadd.xlane.f32.xlu1 %v57_v13 }
 0x125   :  { %v56_v17 = vpop.xlane.xlu1 %55 }
 0x126   :  { %v60_v18 = vmul.f32 0.03125, %v56_v17 }
 0x128   :  { %v62_v19 = vadd.f32 1e-05, %v60_v18 }
 0x129   :  { %v59_v20 = vpop.xlane.xlu1 %58 }
 0x12a   :  { %2139 = vrsqrt.f32 %v62_v19  ;;  %v61_v22 = vmul.f32 0.03125, %v59_v20 }
 0x12c   :  { %v63_v23 = vadd.f32 1e-05, %v61_v22 }
 0x12e   :  { %2141 = vrsqrt.f32 %v63_v23 }
 0x134   :  { %v2140_v27 = vpop.eup %2139 }
 0x135   :  { %v66_v28 = vmul.f32 %v2140_v27, %v50_v6 }
 0x137   :  { %v72_v33 = vmul.f32 %v71_v29, %v66_v28 }
 0x138   :  { %v2142_v31 = vpop.eup %2141 }
 0x139   :  { %v67_v32 = vmul.f32 %v2142_v31, %v51_v10  ;;  %v2326_v36 = vadd.f32 %v77_v34, %v72_v33 }
 0x13b   :  { %v73_v35 = vmul.f32 %v71_v29, %v67_v32 }
 0x13d   :  { %v2328_v37 = vadd.f32 %v77_v34, %v73_v35 }
 0x13f   :  { %v117_v38 = vpack.c.bf16 %v2328_v37, %v2326_v36 }
 0x141   :  { %1935 = vmatmul.mubr.msk.bf16.vlgmr.msra.gmra.mrb[0].mxu1 %vm40_vm0, %v117_v38 }
 0x142   :  { %1940 = vmatprep.mubr.msk.bf16.mxu1 %vm2224_vm1, %v2223_v15 }
 0x214   :  { %v173_v40 = vpop.f32.mrb[0].mxu1 }
 0x215   :  { %v174_v41 = vadd.f32 %v1791_v39, %v173_v40  ;;  %v1936_v42 = vpop.f32.mrb[1].mxu1 }
 0x216   :  { %v176_v43 = vpop.f32.mrb[2].mxu1 }
 0x217   :  { %v2338_v44 = vpack.c.bf16 %v174_v41, %v174_v41  ;;  %v177_v45 = vadd.f32 %v1791_v39, %v176_v43  ;;  %v1937_v46 = vpop.f32.mrb[3].mxu1 }
 0x219   :  { %v2340_v47 = vpack.c.bf16 %v177_v45, %v177_v45  ;;  %186 = vrot.lane.b32.xlu0 %v2338_v44, %s2225_s23 }
 0x21b   :  { %235 = vrot.lane.b32.xlu1 %v2340_v47, %s2225_s23 }
 0x28b   :  { %v187_v48 = vpop.permute.xlu0 %186 }
 0x28c   :  { %v193_v49 = vsel %vm188_vm2, %v187_v48, 0 }
 0x28d   :  { %1939 = vmatpush3.bf16.xpose.msra.mxu1 %v193_v49  ;;  %v236_v50 = vpop.permute.xlu1 %235 }
 0x28e   :  { %v241_v51 = vsel %vm188_vm2, %v236_v50, 0  ;;  %1950 = vmatprep.subr.bf16.mxu1 %v2223_v15 }
 0x28f   :  { %1945 = vmatpush3.bf16.xpose.msra.mxu0 %v241_v51 }
 0x290   :  { %1956 = vmatprep.subr.bf16.mxu0 %v2223_v15 }
 0x294   :  { %1941 = vmatmul.mubr.msk.bf16.vlgmr.msra.gmra.mrb[4].mxu1 %vm188_vm2, %v2338_v44 }
 0x295   :  { %1952 = vmatprep.mubr.msk.bf16.mxu1 %vm2224_vm1, %v2223_v15 }
 0x296   :  { %1947 = vmatmul.mubr.msk.bf16.vlgmr.msra.gmra.mrb[0].mxu0 %vm188_vm2, %v2340_v47 }
 0x297   :  { %1958 = vmatprep.mubr.msk.bf16.mxu0 %vm2224_vm1, %v2223_v15 }
 0x367   :  { %v229_v53 = vpop.f32.mrb[4].mxu1 }
 0x368   :  { %v230_v55 = vadd.f32 %v2361_v52, %v229_v53  ;;  %v1942_v56 = vpop.f32.mrb[5].mxu1 }
 0x369   :  { %v232_v57 = vpop.f32.mrb[6].mxu1  ;;  %v277_v58 = vpop.f32.mrb[0].mxu0 }
 0x36a   :  { %v278_v59 = vadd.f32 %v2366_v54, %v277_v58  ;;  %v1943_v60 = vpop.f32.mrb[7].mxu1  ;;  %v1948_v61 = vpop.f32.mrb[1].mxu0  ;;  %v284_v62 = vsel %vm283_vm3, %v230_v55, -inf }
 0x36b   :  { %v280_v63 = vpop.f32.mrb[2].mxu0  ;;  %285 = vmax.xlane.f32.xlu1 %v284_v62 }
 0x36c   :  { %v1949_v0 = vpop.f32.mrb[3].mxu0  ;;  %v287_v1 = vsel %vm283_vm3, %v278_v59, -inf }
 0x36d   :  { %288 = vmax.xlane.f32.xlu0 %v287_v1 }
 0x37c   :  { %357 = vrot.lane.b32.xlu1 %v2340_v47, %s2226_s1 }
 0x380   :  { %407 = vrot.lane.b32.xlu1 %v2338_v44, %s2227_s28 }
 0x3f8   :  { %v286_v2 = vpop.xlane.xlu1 %285 }
 0x3f9   :  { %v290_v3 = vsub.f32 %v230_v55, %v286_v2 }
 0x3fa   :  { %v289_v4 = vpop.xlane.xlu0 %288 }
 0x3fb   :  { %v292_v5 = vmul.f32 1.442695, %v290_v3  ;;  %v291_v6 = vsub.f32 %v278_v59, %v289_v4 }
 0x3fc   :  { %v358_v7 = vpop.permute.xlu1 %357 }
 0x3fd   :  { %2143 = vpow2.f32 %v292_v5  ;;  %v294_v8 = vmul.f32 1.442695, %v291_v6  ;;  %v363_v9 = vsel %vm313_vm4, %v358_v7, 0 }
 0x3fe   :  { %1957 = vmatpush3.bf16.msra.mxu0 %v363_v9 }
 0x3ff   :  { %2145 = vpow2.f32 %v294_v8  ;;  %1968 = vmatprep.subr.bf16.mxu0 %v2223_v15 }
 0x400   :  { %v408_v14 = vpop.permute.xlu1 %407 }
 0x401   :  { %v413_v28 = vsel %vm188_vm2, %v408_v14, 0 }
 0x407   :  { %v2144_v10 = vpop.eup %2143 }
 0x408   :  { %v296_v11 = vsel %vm283_vm3, %v2144_v10, 0.0 }
 0x409   :  { %v2146_v12 = vpop.eup %2145  ;;  %297 = vadd.xlane.f32.xlu0 %v296_v11 }
 0x40a   :  { %v299_v13 = vsel %vm283_vm3, %v2146_v12, 0.0 }
 0x40b   :  { %300 = vadd.xlane.f32.xlu1 %v299_v13 }
 0x41c   :  { %457 = vrot.lane.b32.xlu1 %v2340_v47, %s2227_s28 }
 0x41f   :  { %308 = vrot.lane.b32.xlu0 %v2338_v44, %s2226_s1 }
 0x420   :  { %455 = vrot.lane.b32.xlu1 %v2340_v47, %s2228_s29 }
 0x423   :  { %405 = vrot.lane.b32.xlu0 %v2338_v44, %s2228_s29 }
 0x496   :  { %v298_v16 = vpop.xlane.xlu0 %297 }
 0x497   :  { %2147 = vrcp.f32 %v298_v16 }
 0x498   :  { %v301_v17 = vpop.xlane.xlu1 %300 }
 0x499   :  { %2149 = vrcp.f32 %v301_v17  ;;  %v2121_v17 = vld [vmem:[%s2709_s5] sm:$0xff]  }
 0x49a   :  { %v309_v18 = vpop.permute.xlu0 %308 }
 0x49b   :  { %v315_v19 = vsel %vm313_vm4, %v309_v18, 0  ;;  %v2122_v18 = vld [vmem:[%s2709_s5 + $0x8] sm:$0xff]  }
 0x49c   :  { %1951 = vmatpush3.bf16.msra.mxu1 %v315_v19  ;;  %v458_v27 = vpop.permute.xlu1 %457 }
 0x49d   :  { %1962 = vmatprep.subr.bf16.mxu1 %v2223_v15  ;;  %v463_v31 = vsel %vm188_vm2, %v458_v27, 0 }
 0x49e   :  { %v406_v32 = vpop.permute.xlu0 %405 }
 0x4a0   :  { %v456_v33 = vpop.permute.xlu1 %455 }
 0x4a1   :  { %v2148_v20 = vpop.eup %2147 }
 0x4a2   :  { %v304_v21 = vmul.f32 %v2148_v20, %v2144_v10 }
 0x4a3   :  { %v2150_v22 = vpop.eup %2149 }
 0x4a4   :  { %v305_v23 = vmul.f32 %v2150_v22, %v2146_v12  ;;  %v306_v26 = vpack.c.bf16 %v304_v21, %v304_v21 }
 0x4a6   :  { %1953 = vmatmul.mubr.msk.bf16.vlgmr.msra.gmra.mrb[8].mxu1 %vm283_vm3, %v306_v26  ;;  %v307_v29 = vpack.c.bf16 %v305_v23, %v305_v23 }
 0x4a7   :  { %1963 = vmatpush3.bf16.xpose.msra.mxu1 %v413_v28  ;;  %1964 = vmatprep.mubr.msk.bf16.mxu1 %vm2224_vm1, %v2223_v15 }
 0x4a8   :  { %1959 = vmatmul.mubr.msk.bf16.vlgmr.msra.gmra.mrb[4].mxu0 %vm283_vm3, %v307_v29  ;;  %1974 = vmatprep.subr.bf16.mxu1 %v2223_v15 }
 0x4a9   :  { %1969 = vmatpush3.bf16.xpose.msra.mxu0 %v463_v31  ;;  %1970 = vmatprep.mubr.msk.bf16.mxu0 %vm2224_vm1, %v2223_v15 }
 0x4aa   :  { %1980 = vmatprep.subr.bf16.mxu0 %v2223_v15 }
 0x4ae   :  { %1965 = vmatmul.mubr.msk.bf16.vlgmr.msra.gmra.mrb[12].mxu1 %vm188_vm2, %v406_v32 }
 0x4af   :  { %1976 = vmatprep.mubr.msk.bf16.mxu1 %vm2224_vm1, %v2223_v15 }
 0x4b0   :  { %1971 = vmatmul.mubr.msk.bf16.vlgmr.msra.gmra.mrb[8].mxu0 %vm188_vm2, %v456_v33 }
 0x4b1   :  { %1982 = vmatprep.mubr.msk.bf16.mxu0 %vm2224_vm1, %v2223_v15 }
 0x579   :  { %v2406_v34 = vpop.f32.mrb[8].mxu1 }
 0x57a   :  { %v1954_v35 = vpop.f32.mrb[9].mxu1 }
 0x57b   :  { %v354_v38 = vpop.f32.mrb[10].mxu1  ;;  %v2408_v39 = vpop.f32.mrb[4].mxu0 }
 0x57c   :  { %v1955_v40 = vpop.f32.mrb[11].mxu1  ;;  %v1960_v41 = vpop.f32.mrb[5].mxu0 }
 0x57d   :  { %v402_v42 = vpop.f32.mrb[6].mxu0  ;;  %v2449_v41 = vld [vmem:[%s2713_s9] sm:$0x3f] }
 0x57e   :  { %v1961_v43 = vpop.f32.mrb[7].mxu0  ;;  %v639_v42 = vrot.slane %v2449_v41, %v2316_v25 }
 0x581   :  { %v449_v45 = vpop.f32.mrb[12].mxu1 }
 0x582   :  { %v450_v46 = vadd.f32 %v2361_v52, %v449_v45  ;;  %v1966_v48 = vpop.f32.mrb[13].mxu1 }
 0x583   :  { %v452_v49 = vpop.f32.mrb[14].mxu1  ;;  %v499_v50 = vpop.f32.mrb[8].mxu0 }
 0x584   :  { %v500_v51 = vadd.f32 %v2366_v54, %v499_v50  ;;  %v1967_v53 = vpop.f32.mrb[15].mxu1  ;;  %v1972_v55 = vpop.f32.mrb[9].mxu0  ;;  %v505_v56 = vsel %vm283_vm3, %v450_v46, -inf }
 0x585   :  { %v502_v57 = vpop.f32.mrb[10].mxu0  ;;  %506 = vmax.xlane.f32.xlu0 %v505_v56 }
 0x586   :  { %v1973_v58 = vpop.f32.mrb[11].mxu0  ;;  %v508_v59 = vsel %vm283_vm3, %v500_v51, -inf }
 0x587   :  { %509 = vmax.xlane.f32.xlu1 %v508_v59 }
 0x598   :  { %577 = vrot.lane.b32.xlu1 %v2340_v47, %s2229_s30 }
 0x612   :  { %v507_v60 = vpop.xlane.xlu0 %506 }
 0x613   :  { %v511_v61 = vsub.f32 %v450_v46, %v507_v60 }
 0x614   :  { %v510_v62 = vpop.xlane.xlu1 %509 }
 0x615   :  { %v513_v63 = vmul.f32 1.442695, %v511_v61  ;;  %v512_v0 = vsub.f32 %v500_v51, %v510_v62 }
 0x617   :  { %2151 = vpow2.f32 %v513_v63  ;;  %v515_v1 = vmul.f32 1.442695, %v512_v0  ;;  %v2124_v0 = vld [vmem:[%s2710_s6 + $0x8] sm:$0xff]  }
 0x618   :  { %v578_v2 = vpop.permute.xlu1 %577 }
 0x619   :  { %2153 = vpow2.f32 %v515_v1  ;;  %v583_v3 = vsel %vm313_vm4, %v578_v2, 0 }
 0x61a   :  { %1981 = vmatpush3.bf16.msra.mxu0 %v583_v3 }
 0x61b   :  { %1994 = vmatprep.subr.bf16.mxu0 %v2223_v15 }
 0x621   :  { %v2152_v4 = vpop.eup %2151 }
 0x622   :  { %v517_v5 = vsel %vm283_vm3, %v2152_v4, 0.0 }
 0x623   :  { %v2154_v6 = vpop.eup %2153  ;;  %518 = vadd.xlane.f32.xlu0 %v517_v5 }
 0x624   :  { %v520_v47 = vsel %vm283_vm3, %v2154_v6, 0.0 }
 0x627   :  { %521 = vadd.xlane.f32.xlu0 %v520_v47  ;;  %v726_v47 = vsub.s32 2, %v2313_v24 }
 0x63d   :  { %529 = vrot.lane.b32.xlu0 %v2338_v44, %s2229_s30 }
 0x6b0   :  { %v519_v7 = vpop.xlane.xlu0 %518 }
 0x6b1   :  { %2155 = vrcp.f32 %v519_v7 }
 0x6b4   :  { %v522_v8 = vpop.xlane.xlu0 %521 }
 0x6b5   :  { %2157 = vrcp.f32 %v522_v8  ;;  %v727_v8 = vrot.slane %v2449_v41, %v726_v47 }
 0x6b8   :  { %v530_v9 = vpop.permute.xlu0 %529 }
 0x6b9   :  { %v535_v10 = vsel %vm313_vm4, %v530_v9, 0 }
 0x6ba   :  { %1975 = vmatpush3.bf16.msra.mxu1 %v535_v10  ;;  %v732_v10 = vsub.s32 3, %v2313_v24 }
 0x6bb   :  { %v2156_v11 = vpop.eup %2155  ;;  %1986 = vmatprep.subr.bf16.mxu1 %v2223_v15 }
 0x6bc   :  { %v525_v12 = vmul.f32 %v2156_v11, %v2152_v4 }
 0x6be   :  { %v527_v13 = vpack.c.bf16 %v525_v12, %v525_v12 }
 0x6bf   :  { %v2158_v14 = vpop.eup %2157 }
 0x6c0   :  { %v526_v16 = vmul.f32 %v2158_v14, %v2154_v6  ;;  %1977 = vmatmul.mubr.msk.bf16.vlgmr.msra.gmra.mrb[16].mxu1 %vm283_vm3, %v527_v13  ;;  %v733_v14 = vrot.slane %v2449_v41, %v732_v10 }
 0x6c1   :  { %1990 = vmatprep.mubr.msk.bf16.mxu1 %vm2224_vm1, %v2223_v15  ;;  %1987 = vmatpush3.bf16.msra.mxu1 %v2121_v17 }
 0x6c2   :  { %v528_v44 = vpack.c.bf16 %v526_v16, %v526_v16  ;;  %1988 = vmatprep.subr.bf16.mxu1 %v2223_v15 }
 0x6c4   :  { %1983 = vmatmul.mubr.msk.bf16.vlgmr.msra.gmra.mrb[12].mxu0 %vm283_vm3, %v528_v44 }
 0x6c5   :  { %1998 = vmatprep.mubr.msk.bf16.mxu0 %vm2224_vm1, %v2223_v15  ;;  %1989 = vmatpush3.bf16.msra.mxu1 %v2122_v18 }
 0x6c6   :  { %2002 = vmatprep.subr.bf16.mxu1 %v2223_v15 }
 0x793   :  { %v571_v19 = vpop.f32.mrb[16].mxu1 }
 0x794   :  { %v1978_v20 = vpop.f32.mrb[17].mxu1 }
 0x795   :  { %v574_v21 = vpop.f32.mrb[18].mxu1  ;;  %v2126_v20 = vld [vmem:[%s2712_s8 + $0x8] sm:$0xff]  }
 0x796   :  { %v1979_v22 = vpop.f32.mrb[19].mxu1  ;;  %v2127_v21 = vld [vmem:[%s2712_s8 + $0x10] sm:$0xff]  }
 0x797   :  { %v619_v23 = vpop.f32.mrb[12].mxu0  ;;  %v2128_v22 = vld [vmem:[%s2712_s8 + $0x18] sm:$0xff]  }
 0x798   :  { %v2109_v26 = vpack.i.bf16 %v619_v23, %v571_v19  ;;  %v1984_v27 = vpop.f32.mrb[13].mxu0  ;;  %v2125_v19 = vld [vmem:[%s2712_s8] sm:$0xff]  }
 0x799   :  { %v622_v28 = vpop.f32.mrb[14].mxu0  ;;  %v1808_v23 = vld [vmem:[%s2711_s7] ss:$0 sm:$0xff] }
 0x79a   :  { %v1985_v29 = vpop.f32.mrb[15].mxu0  ;;  %2110 = vrot.lane.b32.xlu1 %v2109_v26, %s2230_s15 }
 0x80c   :  { %v2111_v31 = vpop.permute.xlu1 %2110 }
 0x80d   :  { %v2113_v32 = vunpack.i.h.bf16 %v2111_v31  ;;  %v2112_v33 = vunpack.i.l.bf16 %v2111_v31 }
 0x80f   :  { %v634_v35 = vsel %vm188_vm2, %v2408_v39, %v2113_v32  ;;  %v633_v38 = vsel %vm188_vm2, %v2406_v34, %v2112_v33 }
 0x810   :  { %v635_v40 = vpack.c.bf16 %v634_v35, %v633_v38 }
 0x812   :  { %1991 = vmatmul.mubr.msk.bf16.vlgmr.msra.gmra.mrb[20].mxu1 %vm40_vm0, %v635_v40 }
 0x813   :  { %2010 = vmatprep.mubr.msk.bf16.mxu1 %vm2224_vm1, %v2223_v15  ;;  %2003 = vmatpush3.bf16.msra.mxu1 %v2125_v19 }
 0x814   :  { %2004 = vmatprep.subr.bf16.mxu1 %v2223_v15 }
 0x817   :  { %2005 = vmatpush3.bf16.msra.mxu1 %v2126_v20 }
 0x818   :  { %2006 = vmatprep.subr.bf16.mxu1 %v2223_v15 }
 0x81b   :  { %2007 = vmatpush3.bf16.msra.mxu1 %v2127_v21 }
 0x81c   :  { %2008 = vmatprep.subr.bf16.mxu1 %v2223_v15 }
 0x81f   :  { %2009 = vmatpush3.bf16.msra.mxu1 %v2128_v22 }
 0x820   :  { %2028 = vmatprep.subr.bf16.mxu1 %v2223_v15 }
 0x8e5   :  { %v689_v43 = vpop.f32.mrb[20].mxu1 }
 0x8e6   :  { %v690_v45 = vadd.f32 %v689_v43, %v639_v42  ;;  %v1992_v39 = vpop.f32.mrb[21].mxu1 }
 0x8e7   :  { %v692_v46 = vpop.f32.mrb[22].mxu1 }
 0x8e8   :  { %v693_v48 = vadd.f32 %v692_v46, %v639_v42  ;;  %v1993_v34 = vpop.f32.mrb[23].mxu1  ;;  %v696_v49 = vadd.f32 %v690_v45, %v2326_v36 }
 0x8ea   :  { %v698_v50 = vsel %vm40_vm0, %v696_v49, 0.0  ;;  %v697_v51 = vadd.f32 %v693_v48, %v2328_v37  ;;  %v2123_v37 = vld [vmem:[%s2710_s6] sm:$0xff]  }
 0x8eb   :  { %699 = vadd.xlane.f32.xlu1 %v698_v50  ;;  %1995 = vmatpush3.bf16.msra.mxu0 %v2123_v37 }
 0x8ec   :  { %v701_v53 = vsel %vm40_vm0, %v697_v51, 0.0  ;;  %1996 = vmatprep.subr.bf16.mxu0 %v2223_v15 }
 0x8ed   :  { %702 = vadd.xlane.f32.xlu0 %v701_v53 }
 0x8ef   :  { %1997 = vmatpush3.bf16.msra.mxu0 %v2124_v0 }
 0x8f0   :  { %2014 = vmatprep.subr.bf16.mxu0 %v2223_v15 }
 0x978   :  { %v700_v55 = vpop.xlane.xlu1 %699 }
 0x979   :  { %v704_v56 = vmul.f32 0.03125, %v700_v55 }
 0x97a   :  { %v703_v57 = vpop.xlane.xlu0 %702 }
 0x97b   :  { %v706_v58 = vsub.f32 %v696_v49, %v704_v56  ;;  %v705_v59 = vmul.f32 0.03125, %v703_v57 }
 0x97d   :  { %v707_v60 = vsub.f32 %v697_v51, %v705_v59  ;;  %v708_v61 = vmul.f32 %v706_v58, %v706_v58  ;;  %v821_v59 = vrot.slane %v2449_v41, %v2323_v30 }
 0x97f   :  { %v710_v62 = vsel %vm40_vm0, %v708_v61, 0.0  ;;  %v709_v63 = vmul.f32 %v707_v60, %v707_v60 }
 0x980   :  { %711 = vadd.xlane.f32.xlu0 %v710_v62 }
 0x981   :  { %v713_v36 = vsel %vm40_vm0, %v709_v63, 0.0 }
 0x984   :  { %714 = vadd.xlane.f32.xlu0 %v713_v36 }
 0xa0d   :  { %v712_v1 = vpop.xlane.xlu0 %711 }
 0xa0e   :  { %v716_v2 = vmul.f32 0.03125, %v712_v1 }
 0xa10   :  { %v718_v3 = vadd.f32 1e-05, %v716_v2 }
 0xa11   :  { %v715_v4 = vpop.xlane.xlu0 %714 }
 0xa12   :  { %2159 = vrsqrt.f32 %v718_v3  ;;  %v717_v5 = vmul.f32 0.03125, %v715_v4 }
 0xa14   :  { %v719_v6 = vadd.f32 1e-05, %v717_v5 }
 0xa16   :  { %2161 = vrsqrt.f32 %v719_v6 }
 0xa1c   :  { %v2160_v7 = vpop.eup %2159 }
 0xa1d   :  { %v722_v9 = vmul.f32 %v2160_v7, %v706_v58 }
 0xa1f   :  { %v728_v12 = vmul.f32 %v727_v8, %v722_v9 }
 0xa20   :  { %v2162_v11 = vpop.eup %2161 }
 0xa21   :  { %v723_v13 = vmul.f32 %v2162_v11, %v707_v60  ;;  %v734_v44 = vadd.f32 %v733_v14, %v728_v12 }
 0xa23   :  { %v729_v16 = vmul.f32 %v727_v8, %v723_v13 }
 0xa25   :  { %v735_v17 = vadd.f32 %v733_v14, %v729_v16  ;;  %v2129_v16 = vld [vmem:[%s2707_s3 + $0x10] sm:$0xff]  }
 0xa27   :  { %v736_v18 = vpack.c.bf16 %v735_v17, %v734_v44 }
 0xa29   :  { %1999 = vmatmul.mubr.msk.bf16.vlgmr.msra.gmra.mrb[16].mxu0 %vm40_vm0, %v736_v18 }
 0xa2a   :  { %2018 = vmatprep.mubr.msk.bf16.mxu0 %vm2224_vm1, %v2223_v15  ;;  %2015 = vmatpush3.bf16.msra.mxu0 %v2129_v16 }
 0xa2b   :  { %2016 = vmatprep.subr.bf16.mxu0 %v2223_v15 }
 0xafc   :  { %v792_v26 = vpop.f32.mrb[16].mxu0 }
 0xafd   :  { %v793_v27 = vadd.f32 %v1808_v23, %v792_v26  ;;  %v2000_v28 = vpop.f32.mrb[17].mxu0 }
 0xafe   :  { %v795_v29 = vpop.f32.mrb[18].mxu0 }
 0xaff   :  { %v801_v31 = vmul.f32 0.044715, %v793_v27  ;;  %v796_v32 = vadd.f32 %v1808_v23, %v795_v29  ;;  %v2001_v33 = vpop.f32.mrb[19].mxu0  ;;  %v799_v51 = vmul.f32 0.5, %v793_v27  ;;  %v921_v23 = vsub.s32 4, %v2313_v24 }
 0xb01   :  { %v803_v35 = vmul.f32 %v801_v31, %v793_v27  ;;  %v802_v38 = vmul.f32 0.044715, %v796_v32  ;;  %v800_v53 = vmul.f32 0.5, %v796_v32  ;;  %v922_v26 = vrot.slane %v2449_v41, %v921_v23 }
 0xb03   :  { %v805_v40 = vmul.f32 %v803_v35, %v793_v27  ;;  %v804_v42 = vmul.f32 %v802_v38, %v796_v32 }
 0xb05   :  { %v807_v43 = vadd.f32 %v805_v40, %v793_v27  ;;  %v806_v45 = vmul.f32 %v804_v42, %v796_v32  ;;  %v927_v27 = vsub.s32 5, %v2313_v24 }
 0xb07   :  { %v809_v39 = vmul.f32 0.7978846, %v807_v43  ;;  %v808_v46 = vadd.f32 %v806_v45, %v796_v32  ;;  %v928_v35 = vrot.slane %v2449_v41, %v927_v27  ;;  %v1840_v45 = vld [vmem:[%s2708_s4 + $0x1] ss:$0 sm:$0xff] }
 0xb09   :  { %2163 = vtanh.f32 %v809_v39  ;;  %v810_v48 = vmul.f32 0.7978846, %v808_v46 }
 0xb0b   :  { %2165 = vtanh.f32 %v810_v48 }
 0xb13   :  { %v2164_v34 = vpop.eup %2163 }
 0xb14   :  { %v813_v49 = vadd.f32 1.0, %v2164_v34 }
 0xb15   :  { %v2166_v50 = vpop.eup %2165 }
 0xb16   :  { %v814_v55 = vadd.f32 1.0, %v2166_v50  ;;  %v815_v56 = vmul.f32 %v813_v49, %v799_v51 }
 0xb18   :  { %v816_v57 = vmul.f32 %v814_v55, %v800_v53 }
 0xb1a   :  { %v817_v58 = vpack.c.bf16 %v816_v57, %v815_v56 }
 0xb1c   :  { %2011 = vmatmul.mubr.msk.bf16.vlgmr.msra.gmra.mrb[24].mxu1 %vm846_vm5, %v817_v58 }
 0xb1d   :  { %2030 = vmatprep.mubr.msk.bf16.mxu1 %vm2224_vm1, %v2223_v15 }
 0xbef   :  { %v884_v60 = vpop.f32.mrb[24].mxu1 }
 0xbf0   :  { %v885_v61 = vadd.f32 %v884_v60, %v821_v59  ;;  %v2012_v62 = vpop.f32.mrb[25].mxu1 }
 0xbf1   :  { %v887_v63 = vpop.f32.mrb[26].mxu1 }
 0xbf2   :  { %v888_v36 = vadd.f32 %v887_v63, %v821_v59  ;;  %v2013_v37 = vpop.f32.mrb[27].mxu1  ;;  %v891_v0 = vadd.f32 %v885_v61, %v734_v44  ;;  %v2130_v44 = vld [vmem:[%s2707_s3 + $0x18] sm:$0xff]  }
 0xbf3   :  { %2017 = vmatpush3.bf16.msra.mxu0 %v2130_v44 }
 0xbf4   :  { %v893_v1 = vsel %vm40_vm0, %v891_v0, 0.0  ;;  %v892_v2 = vadd.f32 %v888_v36, %v735_v17  ;;  %2022 = vmatprep.subr.bf16.mxu0 %v2223_v15 }
 0xbf5   :  { %894 = vadd.xlane.f32.xlu1 %v893_v1 }
 0xbf6   :  { %v896_v3 = vsel %vm40_vm0, %v892_v2, 0.0 }
 0xbf7   :  { %897 = vadd.xlane.f32.xlu0 %v896_v3 }
 0xc82   :  { %v895_v4 = vpop.xlane.xlu1 %894 }
 0xc83   :  { %v899_v5 = vmul.f32 0.03125, %v895_v4 }
 0xc84   :  { %v898_v6 = vpop.xlane.xlu0 %897 }
 0xc85   :  { %v901_v7 = vsub.f32 %v891_v0, %v899_v5  ;;  %v900_v8 = vmul.f32 0.03125, %v898_v6 }
 0xc87   :  { %v902_v9 = vsub.f32 %v892_v2, %v900_v8  ;;  %v903_v11 = vmul.f32 %v901_v7, %v901_v7 }
 0xc89   :  { %v905_v12 = vsel %vm40_vm0, %v903_v11, 0.0  ;;  %v904_v13 = vmul.f32 %v902_v9, %v902_v9 }
 0xc8a   :  { %906 = vadd.xlane.f32.xlu1 %v905_v12 }
 0xc8b   :  { %v908_v14 = vsel %vm40_vm0, %v904_v13, 0.0 }
 0xc8c   :  { %909 = vadd.xlane.f32.xlu0 %v908_v14 }
 0xd17   :  { %v907_v17 = vpop.xlane.xlu1 %906 }
 0xd18   :  { %v911_v18 = vmul.f32 0.03125, %v907_v17 }
 0xd19   :  { %v910_v19 = vpop.xlane.xlu0 %909 }
 0xd1a   :  { %v913_v20 = vadd.f32 1e-05, %v911_v18  ;;  %v912_v21 = vmul.f32 0.03125, %v910_v19 }
 0xd1c   :  { %2167 = vrsqrt.f32 %v913_v20  ;;  %v914_v22 = vadd.f32 1e-05, %v912_v21 }
 0xd1e   :  { %2169 = vrsqrt.f32 %v914_v22 }
 0xd26   :  { %v2168_v28 = vpop.eup %2167 }
 0xd27   :  { %v917_v29 = vmul.f32 %v2168_v28, %v901_v7 }
 0xd28   :  { %v2170_v31 = vpop.eup %2169 }
 0xd29   :  { %v923_v32 = vmul.f32 %v922_v26, %v917_v29  ;;  %v918_v33 = vmul.f32 %v2170_v31, %v902_v9 }
 0xd2b   :  { %v924_v38 = vmul.f32 %v922_v26, %v918_v33  ;;  %v2522_v40 = vadd.f32 %v928_v35, %v923_v32 }
 0xd2d   :  { %v2524_v42 = vadd.f32 %v928_v35, %v924_v38 }
 0xd2f   :  { %v961_v43 = vpack.c.bf16 %v2524_v42, %v2522_v40 }
 0xd31   :  { %2019 = vmatmul.mubr.msk.bf16.vlgmr.msra.gmra.mrb[20].mxu0 %vm40_vm0, %v961_v43 }
 0xd32   :  { %2024 = vmatprep.mubr.msk.bf16.mxu0 %vm2224_vm1, %v2223_v15 }
 0xe04   :  { %v1017_v39 = vpop.f32.mrb[20].mxu0 }
 0xe05   :  { %v1018_v46 = vadd.f32 %v1840_v45, %v1017_v39  ;;  %v2020_v41 = vpop.f32.mrb[21].mxu0 }
 0xe06   :  { %v1020_v48 = vpop.f32.mrb[22].mxu0 }
 0xe07   :  { %v2534_v34 = vpack.c.bf16 %v1018_v46, %v1018_v46  ;;  %v1021_v49 = vadd.f32 %v1840_v45, %v1020_v48  ;;  %v2021_v50 = vpop.f32.mrb[23].mxu0 }
 0xe09   :  { %v2536_v51 = vpack.c.bf16 %v1021_v49, %v1021_v49  ;;  %1030 = vrot.lane.b32.xlu1 %v2534_v34, %s2225_s23 }
 0xe0b   :  { %1078 = vrot.lane.b32.xlu0 %v2536_v51, %s2225_s23 }
 0xe7b   :  { %v1031_v53 = vpop.permute.xlu1 %1030 }
 0xe7c   :  { %v1036_v55 = vsel %vm188_vm2, %v1031_v53, 0 }
 0xe7d   :  { %2023 = vmatpush3.bf16.xpose.msra.mxu0 %v1036_v55  ;;  %v1079_v56 = vpop.permute.xlu0 %1078 }
 0xe7e   :  { %v1084_v57 = vsel %vm188_vm2, %v1079_v56, 0  ;;  %2034 = vmatprep.subr.bf16.mxu0 %v2223_v15 }
 0xe7f   :  { %2029 = vmatpush3.bf16.xpose.msra.mxu1 %v1084_v57 }
 0xe80   :  { %2040 = vmatprep.subr.bf16.mxu1 %v2223_v15 }
 0xe84   :  { %2025 = vmatmul.mubr.msk.bf16.vlgmr.msra.gmra.mrb[24].mxu0 %vm188_vm2, %v2534_v34 }
 0xe85   :  { %2036 = vmatprep.mubr.msk.bf16.mxu0 %vm2224_vm1, %v2223_v15 }
 0xe86   :  { %2031 = vmatmul.mubr.msk.bf16.vlgmr.msra.gmra.mrb[28].mxu1 %vm188_vm2, %v2536_v51 }
 0xe87   :  { %2042 = vmatprep.mubr.msk.bf16.mxu1 %vm2224_vm1, %v2223_v15 }
 0xf57   :  { %v1072_v58 = vpop.f32.mrb[24].mxu0 }
 0xf58   :  { %v1073_v59 = vadd.f32 %v2361_v52, %v1072_v58  ;;  %v2026_v60 = vpop.f32.mrb[25].mxu0 }
 0xf59   :  { %v1075_v61 = vpop.f32.mrb[26].mxu0  ;;  %v1120_v62 = vpop.f32.mrb[28].mxu1 }
 0xf5a   :  { %v1121_v63 = vadd.f32 %v2366_v54, %v1120_v62  ;;  %v2027_v36 = vpop.f32.mrb[27].mxu0  ;;  %v2032_v37 = vpop.f32.mrb[29].mxu1  ;;  %v1126_v0 = vsel %vm283_vm3, %v1073_v59, -inf }
 0xf5b   :  { %1127 = vmax.xlane.f32.xlu1 %v1126_v0  ;;  %v1123_v1 = vpop.f32.mrb[30].mxu1 }
 0xf5c   :  { %v2033_v2 = vpop.f32.mrb[31].mxu1  ;;  %v1129_v3 = vsel %vm283_vm3, %v1121_v63, -inf }
 0xf5d   :  { %1130 = vmax.xlane.f32.xlu0 %v1129_v3 }
 0xf6c   :  { %1150 = vrot.lane.b32.xlu1 %v2534_v34, %s2226_s1 }
 0xfe8   :  { %v1128_v4 = vpop.xlane.xlu1 %1127 }
 0xfe9   :  { %v1132_v5 = vsub.f32 %v1073_v59, %v1128_v4 }
 0xfea   :  { %v1131_v6 = vpop.xlane.xlu0 %1130 }
 0xfeb   :  { %v1134_v7 = vmul.f32 1.442695, %v1132_v5  ;;  %v1133_v8 = vsub.f32 %v1121_v63, %v1131_v6 }
 0xfec   :  { %v1151_v9 = vpop.permute.xlu1 %1150 }
 0xfed   :  { %2171 = vpow2.f32 %v1134_v7  ;;  %v1136_v11 = vmul.f32 1.442695, %v1133_v8  ;;  %v1156_v12 = vsel %vm313_vm4, %v1151_v9, 0 }
 0xfee   :  { %2035 = vmatpush3.bf16.msra.mxu0 %v1156_v12 }
 0xfef   :  { %2173 = vpow2.f32 %v1136_v11  ;;  %2046 = vmatprep.subr.bf16.mxu0 %v2223_v15 }
 0xff7   :  { %v2172_v13 = vpop.eup %2171 }
 0xff8   :  { %v1138_v14 = vsel %vm283_vm3, %v2172_v13, 0.0 }
 0xff9   :  { %v2174_v16 = vpop.eup %2173  ;;  %1139 = vadd.xlane.f32.xlu1 %v1138_v14 }
 0xffa   :  { %v1141_v44 = vsel %vm283_vm3, %v2174_v16, 0.0 }
 0xffb   :  { %1142 = vadd.xlane.f32.xlu0 %v1141_v44 }
0x100a   :  { %1248 = vrot.lane.b32.xlu1 %v2534_v34, %s2227_s28 }
0x100e   :  { %1298 = vrot.lane.b32.xlu1 %v2536_v51, %s2227_s28 }
0x1011   :  { %1198 = vrot.lane.b32.xlu0 %v2536_v51, %s2226_s1 }
0x1012   :  { %1246 = vrot.lane.b32.xlu1 %v2534_v34, %s2228_s29 }
0x1015   :  { %1296 = vrot.lane.b32.xlu0 %v2536_v51, %s2228_s29 }
0x1086   :  { %v1140_v17 = vpop.xlane.xlu1 %1139 }
0x1087   :  { %2175 = vrcp.f32 %v1140_v17 }
0x1088   :  { %v1143_v18 = vpop.xlane.xlu0 %1142 }
0x1089   :  { %2177 = vrcp.f32 %v1143_v18 }
0x108a   :  { %v1249_v21 = vpop.permute.xlu1 %1248 }
0x108b   :  { %v1254_v33 = vsel %vm188_vm2, %v1249_v21, 0  ;;  %v2131_v21 = vld [vmem:[%s2709_s5 + $0x10] sm:$0xff]  }
0x108c   :  { %v1199_v19 = vpop.permute.xlu0 %1198 }
0x108d   :  { %v1204_v20 = vsel %vm313_vm4, %v1199_v19, 0 }
0x108e   :  { %2041 = vmatpush3.bf16.msra.mxu1 %v1204_v20  ;;  %v1299_v32 = vpop.permute.xlu1 %1298 }
0x108f   :  { %2052 = vmatprep.subr.bf16.mxu1 %v2223_v15  ;;  %v1304_v38 = vsel %vm188_vm2, %v1299_v32, 0 }
0x1090   :  { %v1297_v45 = vpop.permute.xlu0 %1296 }
0x1091   :  { %v2176_v22 = vpop.eup %2175 }
0x1092   :  { %v1146_v26 = vmul.f32 %v2176_v22, %v2172_v13  ;;  %v1247_v43 = vpop.permute.xlu1 %1246  ;;  %v2132_v22 = vld [vmem:[%s2709_s5 + $0x18] sm:$0xff]  }
0x1093   :  { %v2178_v28 = vpop.eup %2177 }
0x1094   :  { %v1147_v29 = vmul.f32 %v2178_v28, %v2174_v16  ;;  %v1148_v31 = vpack.c.bf16 %v1146_v26, %v1146_v26 }
0x1096   :  { %2037 = vmatmul.mubr.msk.bf16.vlgmr.msra.gmra.mrb[28].mxu0 %vm283_vm3, %v1148_v31  ;;  %v1149_v35 = vpack.c.bf16 %v1147_v29, %v1147_v29 }
0x1097   :  { %2047 = vmatpush3.bf16.xpose.msra.mxu0 %v1254_v33  ;;  %2048 = vmatprep.mubr.msk.bf16.mxu0 %vm2224_vm1, %v2223_v15 }
0x1098   :  { %2043 = vmatmul.mubr.msk.bf16.vlgmr.msra.gmra.mrb[32].mxu1 %vm283_vm3, %v1149_v35  ;;  %2058 = vmatprep.subr.bf16.mxu0 %v2223_v15 }
0x1099   :  { %2053 = vmatpush3.bf16.xpose.msra.mxu1 %v1304_v38  ;;  %2054 = vmatprep.mubr.msk.bf16.mxu1 %vm2224_vm1, %v2223_v15 }
0x109a   :  { %2064 = vmatprep.subr.bf16.mxu1 %v2223_v15 }
0x109e   :  { %2049 = vmatmul.mubr.msk.bf16.vlgmr.msra.gmra.mrb[32].mxu0 %vm188_vm2, %v1247_v43 }
0x109f   :  { %2060 = vmatprep.mubr.msk.bf16.mxu0 %vm2224_vm1, %v2223_v15 }
0x10a0   :  { %2055 = vmatmul.mubr.msk.bf16.vlgmr.msra.gmra.mrb[36].mxu1 %vm188_vm2, %v1297_v45 }
0x10a1   :  { %2066 = vmatprep.mubr.msk.bf16.mxu1 %vm2224_vm1, %v2223_v15 }
0x1169   :  { %v2592_v39 = vpop.f32.mrb[28].mxu0 }
0x116a   :  { %v2038_v46 = vpop.f32.mrb[29].mxu0 }
0x116b   :  { %v1195_v41 = vpop.f32.mrb[30].mxu0  ;;  %v2594_v48 = vpop.f32.mrb[32].mxu1 }
0x116c   :  { %v2039_v49 = vpop.f32.mrb[31].mxu0  ;;  %v2044_v50 = vpop.f32.mrb[33].mxu1 }
0x116d   :  { %v1243_v53 = vpop.f32.mrb[34].mxu1 }
0x116e   :  { %v2045_v55 = vpop.f32.mrb[35].mxu1 }
0x116f   :  { %v2635_v55 = vld [vmem:[%s2713_s9 + $0x8] sm:$0x3f] }
0x1171   :  { %v1290_v56 = vpop.f32.mrb[32].mxu0 }
0x1172   :  { %v1291_v57 = vadd.f32 %v2361_v52, %v1290_v56  ;;  %v2050_v58 = vpop.f32.mrb[33].mxu0  ;;  %v1480_v56 = vrot.slane %v2635_v55, %v2316_v25 }
0x1173   :  { %v1293_v59 = vpop.f32.mrb[34].mxu0  ;;  %v1340_v60 = vpop.f32.mrb[36].mxu1 }
0x1174   :  { %v1341_v61 = vadd.f32 %v2366_v54, %v1340_v60  ;;  %v2051_v62 = vpop.f32.mrb[35].mxu0  ;;  %v2056_v63 = vpop.f32.mrb[37].mxu1  ;;  %v1346_v36 = vsel %vm283_vm3, %v1291_v57, -inf }
0x1175   :  { %1347 = vmax.xlane.f32.xlu1 %v1346_v36  ;;  %v1343_v37 = vpop.f32.mrb[38].mxu1 }
0x1176   :  { %v2057_v0 = vpop.f32.mrb[39].mxu1  ;;  %v1349_v1 = vsel %vm283_vm3, %v1341_v61, -inf }
0x1177   :  { %1350 = vmax.xlane.f32.xlu0 %v1349_v1 }
0x1186   :  { %1370 = vrot.lane.b32.xlu1 %v2534_v34, %s2229_s30 }
0x1202   :  { %v1348_v2 = vpop.xlane.xlu1 %1347 }
0x1203   :  { %v1352_v52 = vsub.f32 %v1291_v57, %v1348_v2 }
0x1204   :  { %v1351_v3 = vpop.xlane.xlu0 %1350 }
0x1205   :  { %v1354_v4 = vmul.f32 1.442695, %v1352_v52  ;;  %v1353_v5 = vsub.f32 %v1341_v61, %v1351_v3 }
0x1206   :  { %v1371_v6 = vpop.permute.xlu1 %1370 }
0x1207   :  { %2179 = vpow2.f32 %v1354_v4  ;;  %v1356_v54 = vmul.f32 1.442695, %v1353_v5  ;;  %v1376_v7 = vsel %vm313_vm4, %v1371_v6, 0  ;;  %v2134_v6 = vld [vmem:[%s2710_s6 + $0x18] sm:$0xff]  }
0x1208   :  { %2059 = vmatpush3.bf16.msra.mxu0 %v1376_v7 }
0x1209   :  { %2181 = vpow2.f32 %v1356_v54  ;;  %2070 = vmatprep.subr.bf16.mxu0 %v2223_v15 }
0x1211   :  { %v2180_v8 = vpop.eup %2179 }
0x1212   :  { %v1358_v9 = vsel %vm283_vm3, %v2180_v8, 0.0 }
0x1213   :  { %v2182_v11 = vpop.eup %2181  ;;  %1359 = vadd.xlane.f32.xlu0 %v1358_v9 }
0x1214   :  { %v1361_v34 = vsel %vm283_vm3, %v2182_v11, 0.0 }
0x1217   :  { %1362 = vadd.xlane.f32.xlu0 %v1361_v34 }
0x122d   :  { %1418 = vrot.lane.b32.xlu0 %v2536_v51, %s2229_s30 }
0x12a0   :  { %v1360_v12 = vpop.xlane.xlu0 %1359 }
0x12a1   :  { %2183 = vrcp.f32 %v1360_v12  ;;  %v1568_v12 = vrot.slane %v2635_v55, %v726_v47  ;;  %v2136_v47 = vld [vmem:[%s2712_s8 + $0x28] sm:$0xff]  }
0x12a4   :  { %v1363_v13 = vpop.xlane.xlu0 %1362 }
0x12a5   :  { %2185 = vrcp.f32 %v1363_v13 }
0x12a8   :  { %v1419_v14 = vpop.permute.xlu0 %1418 }
0x12a9   :  { %v1424_v16 = vsel %vm313_vm4, %v1419_v14, 0 }
0x12aa   :  { %2065 = vmatpush3.bf16.msra.mxu1 %v1424_v16 }
0x12ab   :  { %v2184_v44 = vpop.eup %2183  ;;  %2078 = vmatprep.subr.bf16.mxu1 %v2223_v15 }
0x12ac   :  { %v1366_v17 = vmul.f32 %v2184_v44, %v2180_v8 }
0x12ae   :  { %v1368_v18 = vpack.c.bf16 %v1366_v17, %v1366_v17 }
0x12af   :  { %v2186_v19 = vpop.eup %2185 }
0x12b0   :  { %v1367_v20 = vmul.f32 %v2186_v19, %v2182_v11  ;;  %2061 = vmatmul.mubr.msk.bf16.vlgmr.msra.gmra.mrb[36].mxu0 %vm283_vm3, %v1368_v18  ;;  %v1574_v18 = vrot.slane %v2635_v55, %v732_v10  ;;  %v2137_v10 = vld [vmem:[%s2712_s8 + $0x30] sm:$0xff]  }
0x12b1   :  { %2074 = vmatprep.mubr.msk.bf16.mxu0 %vm2224_vm1, %v2223_v15  ;;  %2071 = vmatpush3.bf16.msra.mxu0 %v2131_v21 }
0x12b2   :  { %v1369_v51 = vpack.c.bf16 %v1367_v20, %v1367_v20  ;;  %2072 = vmatprep.subr.bf16.mxu0 %v2223_v15 }
0x12b4   :  { %2067 = vmatmul.mubr.msk.bf16.vlgmr.msra.gmra.mrb[40].mxu1 %vm283_vm3, %v1369_v51 }
0x12b5   :  { %2082 = vmatprep.mubr.msk.bf16.mxu1 %vm2224_vm1, %v2223_v15  ;;  %2073 = vmatpush3.bf16.msra.mxu0 %v2132_v22  ;;  %v2135_v22 = vld [vmem:[%s2712_s8 + $0x20] sm:$0xff]  }
0x12b6   :  { %2086 = vmatprep.subr.bf16.mxu0 %v2223_v15 }
0x1383   :  { %v1412_v26 = vpop.f32.mrb[36].mxu0 }
0x1384   :  { %v2062_v28 = vpop.f32.mrb[37].mxu0 }
0x1385   :  { %v1415_v29 = vpop.f32.mrb[38].mxu0  ;;  %v1857_v28 = vld [vmem:[%s2711_s7 + $0x1] ss:$0 sm:$0xff]  ;;  %s2231_s7 = smov [#allocation2]  }
0x1386   :  { %v2063_v31 = vpop.f32.mrb[39].mxu0 }
0x1387   :  { %v1460_v32 = vpop.f32.mrb[40].mxu1 }
0x1388   :  { %v2114_v33 = vpack.i.bf16 %v1460_v32, %v1412_v26  ;;  %v2068_v35 = vpop.f32.mrb[41].mxu1  ;;  %v2138_v26 = vld [vmem:[%s2712_s8 + $0x38] sm:$0xff]   ;;  %s1778_s8 = sshll.u32 %s2231_s7, 4  ;;  %s1779_s8 = int_to_ptr.vmem [resolvable:$true] %s1778_s8 }
0x1389   :  { %v1463_v38 = vpop.f32.mrb[42].mxu1  ;;  %s2199_s12 = scalar_lea.vmem %s1779_s8, 256  ;;  %p2204_p1 = scmp.lt.s32.totalorder %s1779_s8, %s1779_s8 }
0x138a   :  { %2115 = vrot.lane.b32.xlu1 %v2114_v33, %s2230_s15  ;;  %v2069_v43 = vpop.f32.mrb[43].mxu1  ;;  %p2200_p0 = scmp.ne.s32.totalorder %s1779_s8, %s2199_s12  ;;  %p2205_p2 = scmp.lt.s32.totalorder %s2199_s12, %s2199_s12 }
0x138c   :  { %p2206_p3 = por %p2205_p2, %p2204_p1 }
0x138e   :  { %p2207_p4 = pnand %p2206_p3, %p2200_p0 }
0x13fc   :  { %v2116_v45 = vpop.permute.xlu1 %2115 }
0x13fd   :  { %v2118_v46 = vunpack.i.h.bf16 %v2116_v45  ;;  %v2117_v41 = vunpack.i.l.bf16 %v2116_v45 }
0x13ff   :  { %v1475_v49 = vsel %vm188_vm2, %v2594_v48, %v2118_v46  ;;  %v1474_v50 = vsel %vm188_vm2, %v2592_v39, %v2117_v41 }
0x1400   :  { %v1476_v53 = vpack.c.bf16 %v1475_v49, %v1474_v50 }
0x1402   :  { %2075 = vmatmul.mubr.msk.bf16.vlgmr.msra.gmra.mrb[40].mxu0 %vm40_vm0, %v1476_v53 }
0x1403   :  { %2094 = vmatprep.mubr.msk.bf16.mxu0 %vm2224_vm1, %v2223_v15  ;;  %2087 = vmatpush3.bf16.msra.mxu0 %v2135_v22  ;;  %v1768_v22 = vrot.slane %v2635_v55, %v927_v27 }
0x1404   :  { %2088 = vmatprep.subr.bf16.mxu0 %v2223_v15 }
0x1407   :  { %2089 = vmatpush3.bf16.msra.mxu0 %v2136_v47 }
0x1408   :  { %2090 = vmatprep.subr.bf16.mxu0 %v2223_v15 }
0x140b   :  { %2091 = vmatpush3.bf16.msra.mxu0 %v2137_v10 }
0x140c   :  { %2092 = vmatprep.subr.bf16.mxu0 %v2223_v15 }
0x140f   :  { %2093 = vmatpush3.bf16.msra.mxu0 %v2138_v26 }
0x14d5   :  { %v1530_v57 = vpop.f32.mrb[40].mxu0 }
0x14d6   :  { %v1531_v58 = vadd.f32 %v1530_v57, %v1480_v56  ;;  %v2076_v48 = vpop.f32.mrb[41].mxu0 }
0x14d7   :  { %v1533_v59 = vpop.f32.mrb[42].mxu0 }
0x14d8   :  { %v1534_v60 = vadd.f32 %v1533_v59, %v1480_v56  ;;  %v2077_v39 = vpop.f32.mrb[43].mxu0  ;;  %v1537_v61 = vadd.f32 %v1531_v58, %v2522_v40 }
0x14da   :  { %v1539_v62 = vsel %vm40_vm0, %v1537_v61, 0.0  ;;  %v1538_v63 = vadd.f32 %v1534_v60, %v2524_v42  ;;  %v2133_v42 = vld [vmem:[%s2710_s6 + $0x10] sm:$0xff]  }
0x14db   :  { %1540 = vadd.xlane.f32.xlu1 %v1539_v62  ;;  %2079 = vmatpush3.bf16.msra.mxu1 %v2133_v42 }
0x14dc   :  { %v1542_v36 = vsel %vm40_vm0, %v1538_v63, 0.0  ;;  %2080 = vmatprep.subr.bf16.mxu1 %v2223_v15 }
0x14dd   :  { %1543 = vadd.xlane.f32.xlu0 %v1542_v36 }
0x14df   :  { %2081 = vmatpush3.bf16.msra.mxu1 %v2134_v6 }
0x1568   :  { %v1541_v37 = vpop.xlane.xlu1 %1540 }
0x1569   :  { %v1545_v0 = vmul.f32 0.03125, %v1541_v37  ;;  %v1662_v37 = vrot.slane %v2635_v55, %v2323_v30 }
0x156a   :  { %v1544_v1 = vpop.xlane.xlu0 %1543 }
0x156b   :  { %v1547_v25 = vsub.f32 %v1537_v61, %v1545_v0  ;;  %v1546_v2 = vmul.f32 0.03125, %v1544_v1 }
0x156d   :  { %v1548_v52 = vsub.f32 %v1538_v63, %v1546_v2  ;;  %v1549_v3 = vmul.f32 %v1547_v25, %v1547_v25 }
0x156f   :  { %v1551_v4 = vsel %vm40_vm0, %v1549_v3, 0.0  ;;  %v1550_v5 = vmul.f32 %v1548_v52, %v1548_v52 }
0x1570   :  { %1552 = vadd.xlane.f32.xlu0 %v1551_v4 }
0x1571   :  { %v1554_v40 = vsel %vm40_vm0, %v1550_v5, 0.0 }
0x1572   :  { %1555 = vadd.xlane.f32.xlu1 %v1554_v40 }
0x15fd   :  { %v1553_v54 = vpop.xlane.xlu0 %1552 }
0x15fe   :  { %v1557_v7 = vmul.f32 0.03125, %v1553_v54 }
0x15ff   :  { %v1556_v8 = vpop.xlane.xlu1 %1555 }
0x1600   :  { %v1559_v9 = vadd.f32 1e-05, %v1557_v7  ;;  %v1558_v11 = vmul.f32 0.03125, %v1556_v8 }
0x1602   :  { %2187 = vrsqrt.f32 %v1559_v9  ;;  %v1560_v34 = vadd.f32 1e-05, %v1558_v11 }
0x1604   :  { %2189 = vrsqrt.f32 %v1560_v34 }
0x160c   :  { %v2188_v13 = vpop.eup %2187 }
0x160d   :  { %v1563_v14 = vmul.f32 %v2188_v13, %v1547_v25 }
0x160e   :  { %v2190_v16 = vpop.eup %2189 }
0x160f   :  { %v1569_v44 = vmul.f32 %v1568_v12, %v1563_v14  ;;  %v1564_v17 = vmul.f32 %v2190_v16, %v1548_v52 }
0x1611   :  { %v1570_v19 = vmul.f32 %v1568_v12, %v1564_v17  ;;  %v1575_v20 = vadd.f32 %v1574_v18, %v1569_v44 }
0x1613   :  { %v1576_v51 = vadd.f32 %v1574_v18, %v1570_v19 }
0x1615   :  { %v1577_v21 = vpack.c.bf16 %v1576_v51, %v1575_v20 }
0x1617   :  { %2083 = vmatmul.mubr.msk.bf16.vlgmr.msra.gmra.mrb[44].mxu1 %vm40_vm0, %v1577_v21 }
0x16ea   :  { %v1633_v29 = vpop.f32.mrb[44].mxu1 }
0x16eb   :  { %v1634_v31 = vadd.f32 %v1857_v28, %v1633_v29  ;;  %v2084_v32 = vpop.f32.mrb[45].mxu1 }
0x16ec   :  { %v1636_v33 = vpop.f32.mrb[46].mxu1 }
0x16ed   :  { %v1642_v35 = vmul.f32 0.044715, %v1634_v31  ;;  %v1637_v38 = vadd.f32 %v1857_v28, %v1636_v33  ;;  %v2085_v43 = vpop.f32.mrb[47].mxu1  ;;  %v1640_v60 = vmul.f32 0.5, %v1634_v31 }
0x16ef   :  { %v1644_v45 = vmul.f32 %v1642_v35, %v1634_v31  ;;  %v1643_v46 = vmul.f32 0.044715, %v1637_v38  ;;  %v1641_v39 = vmul.f32 0.5, %v1637_v38 }
0x16f1   :  { %v1646_v41 = vmul.f32 %v1644_v45, %v1634_v31  ;;  %v1645_v49 = vmul.f32 %v1643_v46, %v1637_v38 }
0x16f3   :  { %v1648_v50 = vadd.f32 %v1646_v41, %v1634_v31  ;;  %v1647_v53 = vmul.f32 %v1645_v49, %v1637_v38 }
0x16f5   :  { %v1650_v56 = vmul.f32 0.7978846, %v1648_v50  ;;  %v1649_v15 = vadd.f32 %v1647_v53, %v1637_v38 }
0x16f7   :  { %2191 = vtanh.f32 %v1650_v56  ;;  %v1651_v57 = vmul.f32 0.7978846, %v1649_v15 }
0x16f9   :  { %2193 = vtanh.f32 %v1651_v57 }
0x1701   :  { %v2192_v58 = vpop.eup %2191 }
0x1702   :  { %v1654_v48 = vadd.f32 1.0, %v2192_v58 }
0x1703   :  { %v2194_v59 = vpop.eup %2193 }
0x1704   :  { %v1655_v61 = vadd.f32 1.0, %v2194_v59  ;;  %v1656_v62 = vmul.f32 %v1654_v48, %v1640_v60 }
0x1706   :  { %v1657_v63 = vmul.f32 %v1655_v61, %v1641_v39 }
0x1708   :  { %v1658_v36 = vpack.c.bf16 %v1657_v63, %v1656_v62 }
0x170a   :  { %2095 = vmatmul.mubr.msk.bf16.vlgmr.msra.gmra.mrb[44].mxu0 %vm846_vm5, %v1658_v36 }
0x17dd   :  { %v1724_v0 = vpop.f32.mrb[44].mxu0 }
0x17de   :  { %v1725_v1 = vadd.f32 %v1724_v0, %v1662_v37  ;;  %v2096_v25 = vpop.f32.mrb[45].mxu0 }
0x17df   :  { %v1727_v2 = vpop.f32.mrb[46].mxu0 }
0x17e0   :  { %v1728_v52 = vadd.f32 %v1727_v2, %v1662_v37  ;;  %v2097_v3 = vpop.f32.mrb[47].mxu0  ;;  %v1731_v4 = vadd.f32 %v1725_v1, %v1575_v20  ;;  %v1762_v20 = vrot.slane %v2635_v55, %v921_v23 }
0x17e2   :  { %v1733_v5 = vsel %vm40_vm0, %v1731_v4, 0.0  ;;  %v1732_v40 = vadd.f32 %v1728_v52, %v1576_v51 }
0x17e3   :  { %1734 = vadd.xlane.f32.xlu0 %v1733_v5 }
0x17e4   :  { %v1736_v42 = vsel %vm40_vm0, %v1732_v40, 0.0 }
0x17e5   :  { %1737 = vadd.xlane.f32.xlu1 %v1736_v42 }
0x1870   :  { %v1735_v6 = vpop.xlane.xlu0 %1734 }
0x1871   :  { %v1739_v54 = vmul.f32 0.03125, %v1735_v6 }
0x1872   :  { %v1738_v7 = vpop.xlane.xlu1 %1737 }
0x1873   :  { %v1741_v8 = vsub.f32 %v1731_v4, %v1739_v54  ;;  %v1740_v9 = vmul.f32 0.03125, %v1738_v7 }
0x1875   :  { %v1742_v30 = vsub.f32 %v1732_v40, %v1740_v9  ;;  %v1743_v11 = vmul.f32 %v1741_v8, %v1741_v8 }
0x1877   :  { %v1745_v34 = vsel %vm40_vm0, %v1743_v11, 0.0  ;;  %v1744_v12 = vmul.f32 %v1742_v30, %v1742_v30 }
0x1878   :  { %1746 = vadd.xlane.f32.xlu0 %v1745_v34 }
0x1879   :  { %v1748_v13 = vsel %vm40_vm0, %v1744_v12, 0.0 }
0x187a   :  { %1749 = vadd.xlane.f32.xlu1 %v1748_v13 }
0x1905   :  { %v1747_v14 = vpop.xlane.xlu0 %1746 }
0x1906   :  { %v1751_v16 = vmul.f32 0.03125, %v1747_v14 }
0x1907   :  { %v1750_v44 = vpop.xlane.xlu1 %1749 }
0x1908   :  { %v1753_v17 = vadd.f32 1e-05, %v1751_v16  ;;  %v1752_v18 = vmul.f32 0.03125, %v1750_v44 }
0x190a   :  { %2195 = vrsqrt.f32 %v1753_v17  ;;  %v1754_v19 = vadd.f32 1e-05, %v1752_v18 }
0x190c   :  { %2197 = vrsqrt.f32 %v1754_v19 }
0x1914   :  { %v2196_v51 = vpop.eup %2195 }
0x1915   :  { %v1757_v21 = vmul.f32 %v2196_v51, %v1741_v8 }
0x1916   :  { %v2198_v47 = vpop.eup %2197 }
0x1917   :  { %v1758_v10 = vmul.f32 %v2198_v47, %v1742_v30  ;;  %v1763_v26 = vmul.f32 %v1762_v20, %v1757_v21 }
0x1919   :  { %v1764_v28 = vmul.f32 %v1762_v20, %v1758_v10  ;;  %v1769_v29 = vadd.f32 %v1768_v22, %v1763_v26 }
0x191b   :  { %v1770_v31 = vadd.f32 %v1768_v22, %v1764_v28  ;;  %1771 = vst.msk [vmem:[#allocation2] sm:$0xff] %vm40_vm0, %v1769_v29 }
0x191d   :  { %1772 = vst.msk [vmem:[#allocation2 + $0x8] sm:$0xff] %vm40_vm0, %v1770_v31 }
0x191e   :  { %2210 = shalt.err (!%p2207_p4)
}
0x191f   :  { %s2211_s16 = scalar_lea.hbm %s2714_s10, 256 }
0x1920   :  { %p2212_p5 = scmp.ne.s32.totalorder %s2714_s10, %s2211_s16  ;;  %p2215_p6 = scmp.lt.u32.totalorder %s2211_s16, %s2714_s10 }
0x1922   :  { %p2217_p7 = pnand %p2215_p6, %p2212_p5 }
0x1924   :  { %2220 = shalt.err (!%p2217_p7)
}
0x1925   :  { %s2232_s4 = smov 128   ;;  %s2233_s23 = smov 8  }
0x1926   :  { %1784 = dma.vmem_to_hbm [thread:$0]  %s1779_s8, 256, %s2714_s10, [#allocation3], %s2232_s4, %s2232_s4, %s2233_s23  }
0x1927   :  { %2221 = dma.done.wait [#allocation3], 256  }
0x1928   :  { %2222 = vsyncadd [#allocation3], 4294967040 }
0x1929   :  { %1788 = vsyncpa [#allocation3], 1 }

</bundles_post_ra>
